<compile_context>
chip_gen: v7x
topology: tpu7x:2x2x1
jax: 0.10.0
libtpu: 0.0.40
codegen_flags: <defaults>
</compile_context>

<pallas_src>
import functools

import jax
import jax.numpy as jnp
from jax import lax
from jax.experimental import pallas as pl
from jax.experimental.pallas import tpu as pltpu

EPS = 1e-5
LANE = 128


def _round_up(x, m):
    return (x + m - 1) // m * m


# --------------------------------------------------------------------------- #
# Kernel
# --------------------------------------------------------------------------- #
def bottleneck_kernel(x_ref, w1_ref, b1_ref, w2_ref, b2_ref, w3_ref, b3_ref,
                      o_ref, *, L, w_p):
    """One (TM, C) row tile.  TM is a multiple of L and tiles start on sample
    boundaries, so the conv2 window is fully contained in the tile."""
    x_bf16 = x_ref[...].astype(jnp.bfloat16)

    # conv1 (1x1) + folded BN1 + ReLU  -- bf16 MXU inputs, f32 accumulation
    h1 = jnp.dot(x_bf16, w1_ref[...], preferred_element_type=jnp.float32)
    h1 = jnp.maximum(h1 + b1_ref[...], 0.0)                  # (TM, W_p) f32

    # conv2 (k=3, pad=1, stride=1, groups=1) as three accumulated dots on static
    # slices of the packed (3W_p, W_p) weight -- no (TM, 3W_p) concat temp.
    tm = h1.shape[0]
    row = lax.broadcasted_iota(jnp.int32, (tm, 1), 0) % L    # column mask, broadcasts
    h1_prev = jnp.where(row == 0, 0.0, pltpu.roll(h1, shift=1, axis=0))
    h1_next = jnp.where(row == L - 1, 0.0, pltpu.roll(h1, shift=tm - 1, axis=0))

    h2 = jnp.dot(h1_prev.astype(jnp.bfloat16), w2_ref[0:w_p, :],
                 preferred_element_type=jnp.float32)
    h2 = h2 + jnp.dot(h1.astype(jnp.bfloat16), w2_ref[w_p:2 * w_p, :],
                      preferred_element_type=jnp.float32)
    h2 = h2 + jnp.dot(h1_next.astype(jnp.bfloat16), w2_ref[2 * w_p:3 * w_p, :],
                      preferred_element_type=jnp.float32)
    h2 = jnp.maximum(h2 + b2_ref[...], 0.0)                  # (TM, W_p) f32

    # conv3 (1x1) + folded BN3
    h3 = jnp.dot(h2.astype(jnp.bfloat16), w3_ref[...],
                 preferred_element_type=jnp.float32) + b3_ref[...]

    # residual add (downsample=None -> identity = x) + final ReLU.
    # x is re-read here instead of keeping an f32 copy live across all matmuls.
    o_ref[...] = jnp.maximum(h3 + x_ref[...].astype(jnp.float32),
                             0.0).astype(o_ref.dtype)


# --------------------------------------------------------------------------- #
# Parameter preparation (fold BN, pack conv2 taps, pad to lane multiples, bf16)
# --------------------------------------------------------------------------- #
def prepare_kernel_params(w1f, b1, w2f, b2, w3f, b3):
    """Inputs are BN-folded conv weights in PyTorch layout:
       w1f (W, Cin, 1), w2f (W, W, 3), w3f (Cout, W, 1), biases (C,)."""
    W, Cin, _ = w1f.shape
    Cout = w3f.shape[0]
    cin_p, w_p, cout_p = (_round_up(c, LANE) for c in (Cin, W, Cout))

    def pad2(a, r, c):
        return jnp.pad(a, ((0, r - a.shape[0]), (0, c - a.shape[1])))

    w1k = pad2(w1f[:, :, 0].T, cin_p, w_p).astype(jnp.bfloat16)       # (Cin_p, W_p)
    w3k = pad2(w3f[:, :, 0].T, w_p, cout_p).astype(jnp.bfloat16)      # (W_p, Cout_p)
    # pack conv2 taps [prev | center | next] along K
    w2k = jnp.concatenate([pad2(w2f[:, :, k].T, w_p, w_p) for k in range(3)],
                          axis=0).astype(jnp.bfloat16)                 # (3*W_p, W_p)
    b1k = jnp.pad(b1, (0, w_p - W))[None, :].astype(jnp.float32)
    b2k = jnp.pad(b2, (0, w_p - W))[None, :].astype(jnp.float32)
    b3k = jnp.pad(b3, (0, cout_p - Cout))[None, :].astype(jnp.float32)

    meta = dict(cin=Cin, width=W, cout=Cout, cin_p=cin_p, w_p=w_p, cout_p=cout_p)
    return (w1k, b1k, w2k, b2k, w3k, b3k), meta


# --------------------------------------------------------------------------- #
# Tile / VMEM sizing (generation-aware)
# --------------------------------------------------------------------------- #
def _vmem_budgets():
    """(tile budget, vmem_limit_bytes) picked from the chip's physical VMEM."""
    try:
        cap = pltpu.get_tpu_info().vmem_capacity_bytes
    except Exception:
        cap = 64 << 20                       # be conservative if query unavailable
    if cap >= (100 << 20):                   # v5e / v6e: 128 MiB physical VMEM
        return 48 << 20, 96 << 20
    return 20 << 20, 32 << 20                # v7x: 64 MiB physical VMEM


def _choose_rows_per_tile(L, n_samples, cin_p, w_p, cout_p, out_bytes, *,
                          max_rows, budget_bytes, min_grid_steps=2):
    """Largest sample-aligned row tile whose VMEM footprint fits the budget,
    while keeping at least `min_grid_steps` grid steps (megacore + pipeline)."""
    def vmem_est(rows):
        io = 2 * rows * cin_p * 4 + 2 * rows * cout_p * out_bytes      # dbl-buffered I/O
        wts = 2 * (cin_p * w_p + 3 * w_p * w_p + w_p * cout_p) * 2     # bf16 weights (worst case 2x)
        wts += 3 * max(w_p, cout_p) * 4                                # biases
        act = rows * (4 * w_p * 4 + 3 * w_p * 2 + cout_p * 4)          # f32 temps + bf16 casts
        return io + wts + act

    # cap samples/tile so the 1-D grid has >= min_grid_steps steps when possible
    if n_samples >= min_grid_steps:
        spt_cap = max(1, -(-n_samples // min_grid_steps))
    else:
        spt_cap = n_samples

    best = None
    for spt in range(1, spt_cap + 1):
        rows = spt * L
        if rows > max_rows or vmem_est(rows) > budget_bytes:
            break
        if rows % 8 == 0:                                              # sublane alignment
            best = rows
    if best is None:
        # hardened fallback: smallest sublane-aligned sample-aligned tile; only if
        # no such tile exists at all, use a single full-extent block.
        for spt in range(1, n_samples + 1):
            rows = spt * L
            if rows % 8 == 0:
                best = rows
                break
        if best is None:
            best = n_samples * L
    return best


# --------------------------------------------------------------------------- #
# Forward wrappers
# --------------------------------------------------------------------------- #
def bottleneck_forward_rows(x_bld, kparams, meta, *, out_dtype=jnp.float32,
                            max_rows_per_tile=2048):
    """Channels-last entry point: x_bld (B, L, Cin) -> (B, L, Cout).
    Avoids the full-tensor HBM transposes of the NCL adapter."""
    w1k, b1k, w2k, b2k, w3k, b3k = kparams
    cin, cout = meta["cin"], meta["cout"]
    cin_p, w_p, cout_p = meta["cin_p"], meta["w_p"], meta["cout_p"]
    assert cin == cout and cin_p == cout_p, \
        "downsample=None requires in_channel == out_channel * expansion"

    B, L, Cin = x_bld.shape
    assert Cin == cin

    x_rows = x_bld.reshape(B * L, Cin)
    if cin_p != Cin:                                # pad channels only when needed
        x_rows = jnp.pad(x_rows, ((0, 0), (0, cin_p - Cin)))

    budget_bytes, vmem_limit = _vmem_budgets()
    out_bytes = jnp.dtype(out_dtype).itemsize
    tm = _choose_rows_per_tile(L, B, cin_p, w_p, cout_p, out_bytes,
                               max_rows=max_rows_per_tile,
                               budget_bytes=budget_bytes)
    spt = tm // L
    n_samples_p = _round_up(B, spt)
    m_p = n_samples_p * L
    if m_p > B * L:                                 # pad with whole fake samples
        x_rows = jnp.pad(x_rows, ((0, m_p - B * L), (0, 0)))
    grid = (m_p // tm,)

    flops = 2 * m_p * (cin_p * w_p + 3 * w_p * w_p + w_p * cout_p)
    bytes_accessed = (m_p * (cin_p * x_rows.dtype.itemsize + cout_p * out_bytes)
                      + (cin_p * w_p + 3 * w_p * w_p + w_p * cout_p) * 2)

    kernel = functools.partial(bottleneck_kernel, L=L, w_p=w_p)

    def const_spec(shape, weight_buffers):
        # grid-invariant weights/biases: single-buffer them when supported
        if weight_buffers == 1:
            return pl.BlockSpec(shape, lambda i: (0, 0),
                                pipeline_mode=pl.Buffered(1))
        return pl.BlockSpec(shape, lambda i: (0, 0))

    def run(weight_buffers):
        in_specs = [pl.BlockSpec((tm, cin_p), lambda i: (i, 0))]
        for shape in ((cin_p, w_p), (1, w_p), (3 * w_p, w_p), (1, w_p),
                      (w_p, cout_p), (1, cout_p)):
            in_specs.append(const_spec(shape, weight_buffers))
        return pl.pallas_call(
            kernel,
            out_shape=jax.ShapeDtypeStruct((m_p, cout_p), out_dtype),
            grid_spec=pltpu.PrefetchScalarGridSpec(
                num_scalar_prefetch=0,
                grid=grid,
                in_specs=in_specs,
                out_specs=pl.BlockSpec((tm, cout_p), lambda i: (i, 0)),
            ),
            compiler_params=pltpu.CompilerParams(
                dimension_semantics=("parallel",),   # row tiles shard across TCs
                vmem_limit_bytes=vmem_limit,
            ),
            cost_estimate=pl.CostEstimate(flops=flops, transcendentals=0,
                                          bytes_accessed=bytes_accessed),
        )(x_rows, w1k, b1k, w2k, b2k, w3k, b3k)

    try:
        out = run(1)          # single-buffered weights (saves VMEM for bigger TM)
    except Exception:
        out = run(2)          # safe fallback: default double-buffering

    return out[: B * L, :cout].reshape(B, L, cout)


def bottleneck_forward(x_ncl, kparams, meta, **kwargs):
    """PyTorch-layout adapter: x_ncl (B, C_in, L) -> (B, C_out, L).
    # TODO(synk): when embedded in a channels-last JAX model, call
    # bottleneck_forward_rows directly and drop these two HBM transposes."""
    x_bld = jnp.transpose(x_ncl, (0, 2, 1)).astype(jnp.float32)
    out = bottleneck_forward_rows(x_bld, kparams, meta, **kwargs)
    return jnp.transpose(out, (0, 2, 1))


# --------------------------------------------------------------------------- #
# Parameter construction + pure-JAX reference
# --------------------------------------------------------------------------- #
def make_params(key, in_channel, out_channel, groups=1, width_per_group=64):
    expansion = 4
    width = int(out_channel * (width_per_group / 64.0)) * groups
    cout = out_channel * expansion
    ks = jax.random.split(key, 6)

    # PyTorch Conv1d weight layout: (out_ch, in_ch, k)
    conv1_w = jax.random.normal(ks[0], (width, in_channel, 1), jnp.float32) * 0.2
    conv2_w = jax.random.normal(ks[1], (width, width, 3), jnp.float32) * 0.2
    conv3_w = jax.random.normal(ks[2], (cout, width, 1), jnp.float32) * 0.2

    def make_bn(k, c):
        k1, k2, k3, k4 = jax.random.split(k, 4)
        gamma = 1.0 + 0.1 * jax.random.normal(k1, (c,), jnp.float32)
        beta = 0.1 * jax.random.normal(k2, (c,), jnp.float32)
        mean = 0.1 * jax.random.normal(k3, (c,), jnp.float32)
        var = 0.5 + 0.1 * jnp.abs(jax.random.normal(k4, (c,), jnp.float32))
        return gamma, beta, mean, var

    bn1, bn2, bn3 = make_bn(ks[3], width), make_bn(ks[4], width), make_bn(ks[5], cout)

    def fold(w, bn):
        gamma, beta, mean, var = bn
        scale = gamma / jnp.sqrt(var + EPS)
        return w * scale[:, None, None], beta - mean * scale

    w1f, b1 = fold(conv1_w, bn1)
    w2f, b2 = fold(conv2_w, bn2)
    w3f, b3 = fold(conv3_w, bn3)
    folded = (w1f, b1, w2f, b2, w3f, b3)
    raw = (conv1_w, conv2_w, conv3_w, bn1, bn2, bn3)
    return folded, raw


def reference_forward(x_ncl, raw):
    """Pure-JAX f32 reference using lax.conv (NCL layout), for validation only."""
    conv1_w, conv2_w, conv3_w, bn1, bn2, bn3 = raw
    dn = ("NCH", "OIH", "NCH")

    def bn_apply(y, bn):
        gamma, beta, mean, var = bn
        g, b = gamma[None, :, None], beta[None, :, None]
        m, v = mean[None, :, None], var[None, :, None]
        return (y - m) / jnp.sqrt(v + EPS) * g + b

    y = lax.conv_general_dilated(x_ncl, conv1_w, (1,), "VALID", dimension_numbers=dn)
    y = jax.nn.relu(bn_apply(y, bn1))
    y = lax.conv_general_dilated(y, conv2_w, (1,), ((1, 1),), dimension_numbers=dn)
    y = jax.nn.relu(bn_apply(y, bn2))
    y = lax.conv_general_dilated(y, conv3_w, (1,), "VALID", dimension_numbers=dn)
    y = bn_apply(y, bn3)
    return jax.nn.relu(y + x_ncl)


if __name__ == "__main__":
    key = jax.random.PRNGKey(0)
    kx, kp, kx2 = jax.random.split(key, 3)

    B, out_channel, L = 2, 4, 16
    in_channel = out_channel * 4   # required so identity add is valid (downsample=None)

    folded, raw = make_params(kp, in_channel, out_channel)
    kparams, meta = prepare_kernel_params(*folded)

    # test 1: small shapes, 2 grid steps (one sample per tile)
    x = jax.random.normal(kx, (B, in_channel, L), jnp.float32)       # PyTorch NCL layout
    out = jax.block_until_ready(bottleneck_forward(x, kparams, meta))
    ref = reference_forward(x, raw)
    assert out.shape == (B, in_channel, L)
    assert jnp.allclose(out, ref, atol=5e-2, rtol=5e-2), "mismatch vs reference"

    # test 2: multi-tile path with a padded (fake) sample: 3 samples, 2 samples/tile
    B2, L2 = 3, 32
    x2 = jax.random.normal(kx2, (B2, in_channel, L2), jnp.float32)
    out2 = jax.block_until_ready(
        bottleneck_forward(x2, kparams, meta, max_rows_per_tile=2 * L2))
    ref2 = reference_forward(x2, raw)
    assert out2.shape == (B2, in_channel, L2)
    assert jnp.allclose(out2, ref2, atol=5e-2, rtol=5e-2), "mismatch vs reference (tiled)"

    print("KERNEL_OK")
</pallas_src>

<mosaic_0001>
module attributes {stable_mosaic.version = 11 : i64} {
  func.func @bottleneck_kernel(%arg0: i32, %arg1: memref<16x128xf32, #tpu.memory_space<vmem>>, %arg2: memref<128x128xbf16, #tpu.memory_space<vmem>>, %arg3: memref<1x128xf32, #tpu.memory_space<vmem>>, %arg4: memref<384x128xbf16, #tpu.memory_space<vmem>>, %arg5: memref<1x128xf32, #tpu.memory_space<vmem>>, %arg6: memref<128x128xbf16, #tpu.memory_space<vmem>>, %arg7: memref<1x128xf32, #tpu.memory_space<vmem>>, %arg8: memref<16x128xf32, #tpu.memory_space<vmem>>) attributes {dimension_semantics = [#tpu.dimension_semantics<parallel>], iteration_bounds = array<i64: 2>, scalar_prefetch = 0 : i64, scratch_operands = 0 : i64, tpu.core_type = #tpu.core_type<tc>, window_params = [{transform_indices = @transform_0, window_bounds = array<i64: 16, 128>}, {pipeline_mode = #tpu.pipeline_mode<synchronous>, transform_indices = @transform_1, window_bounds = array<i64: 128, 128>}, {pipeline_mode = #tpu.pipeline_mode<synchronous>, transform_indices = @transform_2, window_bounds = array<i64: 1, 128>}, {pipeline_mode = #tpu.pipeline_mode<synchronous>, transform_indices = @transform_3, window_bounds = array<i64: 384, 128>}, {pipeline_mode = #tpu.pipeline_mode<synchronous>, transform_indices = @transform_4, window_bounds = array<i64: 1, 128>}, {pipeline_mode = #tpu.pipeline_mode<synchronous>, transform_indices = @transform_5, window_bounds = array<i64: 128, 128>}, {pipeline_mode = #tpu.pipeline_mode<synchronous>, transform_indices = @transform_6, window_bounds = array<i64: 1, 128>}, {transform_indices = @transform_7, window_bounds = array<i64: 16, 128>}]} {
    %c0 = arith.constant 0 : index
    %c0_0 = arith.constant 0 : index
    %0 = vector.load %arg1[%c0, %c0_0] : memref<16x128xf32, #tpu.memory_space<vmem>>, vector<16x128xf32>
    %1 = arith.truncf %0 : vector<16x128xf32> to vector<16x128xbf16>
    %c0_1 = arith.constant 0 : index
    %c0_2 = arith.constant 0 : index
    %2 = vector.load %arg2[%c0_1, %c0_2] : memref<128x128xbf16, #tpu.memory_space<vmem>>, vector<128x128xbf16>
    %cst = arith.constant dense<0.000000e+00> : vector<16x128xf32>
    %3 = tpu.matmul %1, %2, %cst {dimension_numbers = #tpu.dot_dimension_numbers<[1], [0], [0], [1], [0, 0, 1, 1], [], []>} : vector<16x128xbf16>, vector<128x128xbf16>, vector<16x128xf32> -> vector<16x128xf32>
    %c0_3 = arith.constant 0 : index
    %c0_4 = arith.constant 0 : index
    %4 = vector.load %arg3[%c0_3, %c0_4] : memref<1x128xf32, #tpu.memory_space<vmem>>, vector<1x128xf32>
    %5 = vector.broadcast %4 : vector<1x128xf32> to vector<16x128xf32>
    %6 = arith.addf %3, %5 : vector<16x128xf32>
    %cst_5 = arith.constant 0.000000e+00 : f32
    %7 = vector.broadcast %cst_5 : f32 to vector<16x128xf32>
    %8 = arith.maximumf %6, %7 : vector<16x128xf32>
    %9 = tpu.iota {dimensions = array<i32: 0>} : vector<16x1xi32>
    %c16_i32 = arith.constant 16 : i32
    %c0_i32 = arith.constant 0 : i32
    %10 = arith.cmpi eq, %c16_i32, %c0_i32 : i32
    %c1_i32 = arith.constant 1 : i32
    %11 = arith.select %10, %c1_i32, %c16_i32 : i32
    %12 = vector.broadcast %11 : i32 to vector<16x1xi32>
    %13 = arith.remsi %9, %12 : vector<16x1xi32>
    %c0_i32_6 = arith.constant 0 : i32
    %14 = vector.broadcast %c0_i32_6 : i32 to vector<16x1xi32>
    %15 = arith.cmpi ne, %13, %14 : vector<16x1xi32>
    %c0_i32_7 = arith.constant 0 : i32
    %16 = vector.broadcast %c0_i32_7 : i32 to vector<16x1xi32>
    %17 = arith.cmpi slt, %13, %16 : vector<16x1xi32>
    %c0_i32_8 = arith.constant 0 : i32
    %18 = arith.cmpi slt, %11, %c0_i32_8 : i32
    %19 = vector.broadcast %18 : i1 to vector<16x1xi1>
    %20 = vector.broadcast %19 : vector<16x1xi1> to vector<16x1xi1>
    %21 = arith.xori %17, %20 : vector<16x1xi1>
    %22 = arith.andi %21, %15 : vector<16x1xi1>
    %23 = vector.broadcast %11 : i32 to vector<16x1xi32>
    %24 = arith.addi %13, %23 : vector<16x1xi32>
    %25 = arith.select %22, %24, %13 : vector<16x1xi1>, vector<16x1xi32>
    %c0_i32_9 = arith.constant 0 : i32
    %26 = vector.broadcast %c0_i32_9 : i32 to vector<16x1xi32>
    %27 = arith.cmpi eq, %25, %26 : vector<16x1xi32>
    %c1_i32_10 = arith.constant 1 : i32
    %28 = tpu.dynamic_rotate %8 by %c1_i32_10 dim 0 : vector<16x128xf32>, i32 -> vector<16x128xf32>
    %cst_11 = arith.constant 0.000000e+00 : f32
    %29 = vector.shape_cast %27 : vector<16x1xi1> to vector<16x1xi1>
    %30 = vector.broadcast %29 : vector<16x1xi1> to vector<16x128xi1>
    %31 = vector.broadcast %cst_11 : f32 to vector<16x128xf32>
    %32 = arith.select %30, %31, %28 : vector<16x128xi1>, vector<16x128xf32>
    %c15_i32 = arith.constant 15 : i32
    %33 = vector.broadcast %c15_i32 : i32 to vector<16x1xi32>
    %34 = arith.cmpi eq, %25, %33 : vector<16x1xi32>
    %c15_i32_12 = arith.constant 15 : i32
    %35 = tpu.dynamic_rotate %8 by %c15_i32_12 dim 0 : vector<16x128xf32>, i32 -> vector<16x128xf32>
    %cst_13 = arith.constant 0.000000e+00 : f32
    %36 = vector.shape_cast %34 : vector<16x1xi1> to vector<16x1xi1>
    %37 = vector.broadcast %36 : vector<16x1xi1> to vector<16x128xi1>
    %38 = vector.broadcast %cst_13 : f32 to vector<16x128xf32>
    %39 = arith.select %37, %38, %35 : vector<16x128xi1>, vector<16x128xf32>
    %40 = arith.truncf %32 : vector<16x128xf32> to vector<16x128xbf16>
    %c0_14 = arith.constant 0 : index
    %c0_15 = arith.constant 0 : index
    %41 = vector.load %arg4[%c0_14, %c0_15] : memref<384x128xbf16, #tpu.memory_space<vmem>>, vector<128x128xbf16>
    %cst_16 = arith.constant dense<0.000000e+00> : vector<16x128xf32>
    %42 = tpu.matmul %40, %41, %cst_16 {dimension_numbers = #tpu.dot_dimension_numbers<[1], [0], [0], [1], [0, 0, 1, 1], [], []>} : vector<16x128xbf16>, vector<128x128xbf16>, vector<16x128xf32> -> vector<16x128xf32>
    %43 = arith.truncf %8 : vector<16x128xf32> to vector<16x128xbf16>
    %c128 = arith.constant 128 : index
    %c0_17 = arith.constant 0 : index
    %44 = vector.load %arg4[%c128, %c0_17] : memref<384x128xbf16, #tpu.memory_space<vmem>>, vector<128x128xbf16>
    %cst_18 = arith.constant dense<0.000000e+00> : vector<16x128xf32>
    %45 = tpu.matmul %43, %44, %cst_18 {dimension_numbers = #tpu.dot_dimension_numbers<[1], [0], [0], [1], [0, 0, 1, 1], [], []>} : vector<16x128xbf16>, vector<128x128xbf16>, vector<16x128xf32> -> vector<16x128xf32>
    %46 = arith.addf %42, %45 : vector<16x128xf32>
    %47 = arith.truncf %39 : vector<16x128xf32> to vector<16x128xbf16>
    %c256 = arith.constant 256 : index
    %c0_19 = arith.constant 0 : index
    %48 = vector.load %arg4[%c256, %c0_19] : memref<384x128xbf16, #tpu.memory_space<vmem>>, vector<128x128xbf16>
    %cst_20 = arith.constant dense<0.000000e+00> : vector<16x128xf32>
    %49 = tpu.matmul %47, %48, %cst_20 {dimension_numbers = #tpu.dot_dimension_numbers<[1], [0], [0], [1], [0, 0, 1, 1], [], []>} : vector<16x128xbf16>, vector<128x128xbf16>, vector<16x128xf32> -> vector<16x128xf32>
    %50 = arith.addf %46, %49 : vector<16x128xf32>
    %c0_21 = arith.constant 0 : index
    %c0_22 = arith.constant 0 : index
    %51 = vector.load %arg5[%c0_21, %c0_22] : memref<1x128xf32, #tpu.memory_space<vmem>>, vector<1x128xf32>
    %52 = vector.broadcast %51 : vector<1x128xf32> to vector<16x128xf32>
    %53 = arith.addf %50, %52 : vector<16x128xf32>
    %cst_23 = arith.constant 0.000000e+00 : f32
    %54 = vector.broadcast %cst_23 : f32 to vector<16x128xf32>
    %55 = arith.maximumf %53, %54 : vector<16x128xf32>
    %56 = arith.truncf %55 : vector<16x128xf32> to vector<16x128xbf16>
    %c0_24 = arith.constant 0 : index
    %c0_25 = arith.constant 0 : index
    %57 = vector.load %arg6[%c0_24, %c0_25] : memref<128x128xbf16, #tpu.memory_space<vmem>>, vector<128x128xbf16>
    %cst_26 = arith.constant dense<0.000000e+00> : vector<16x128xf32>
    %58 = tpu.matmul %56, %57, %cst_26 {dimension_numbers = #tpu.dot_dimension_numbers<[1], [0], [0], [1], [0, 0, 1, 1], [], []>} : vector<16x128xbf16>, vector<128x128xbf16>, vector<16x128xf32> -> vector<16x128xf32>
    %c0_27 = arith.constant 0 : index
    %c0_28 = arith.constant 0 : index
    %59 = vector.load %arg7[%c0_27, %c0_28] : memref<1x128xf32, #tpu.memory_space<vmem>>, vector<1x128xf32>
    %60 = vector.broadcast %59 : vector<1x128xf32> to vector<16x128xf32>
    %61 = arith.addf %58, %60 : vector<16x128xf32>
    %c0_29 = arith.constant 0 : index
    %c0_30 = arith.constant 0 : index
    %62 = vector.load %arg1[%c0_29, %c0_30] : memref<16x128xf32, #tpu.memory_space<vmem>>, vector<16x128xf32>
    %63 = arith.addf %61, %62 : vector<16x128xf32>
    %cst_31 = arith.constant 0.000000e+00 : f32
    %64 = vector.broadcast %cst_31 : f32 to vector<16x128xf32>
    %65 = arith.maximumf %63, %64 : vector<16x128xf32>
    %c0_32 = arith.constant 0 : index
    %c0_33 = arith.constant 0 : index
    %66 = vector.load %arg8[%c0_32, %c0_33] : memref<16x128xf32, #tpu.memory_space<vmem>>, vector<16x128xf32>
    tpu.vector_store %arg8[%c0_32, %c0_33], %65 {strides = array<i32>} : memref<16x128xf32, #tpu.memory_space<vmem>>, vector<16x128xf32>,
    return
  }
  func.func @transform_0(%arg0: i32) -> (i32, i32) {
    %c0_i32 = arith.constant 0 : i32
    %c0_i32_0 = arith.constant 0 : i32
    return %arg0, %c0_i32 : i32, i32
  }
  func.func @transform_1(%arg0: i32) -> (i32, i32) {
    %c0_i32 = arith.constant 0 : i32
    %c0_i32_0 = arith.constant 0 : i32
    %c0_i32_1 = arith.constant 0 : i32
    return %c0_i32, %c0_i32_0 : i32, i32
  }
  func.func @transform_2(%arg0: i32) -> (i32, i32) {
    %c0_i32 = arith.constant 0 : i32
    %c0_i32_0 = arith.constant 0 : i32
    %c0_i32_1 = arith.constant 0 : i32
    return %c0_i32, %c0_i32_0 : i32, i32
  }
  func.func @transform_3(%arg0: i32) -> (i32, i32) {
    %c0_i32 = arith.constant 0 : i32
    %c0_i32_0 = arith.constant 0 : i32
    %c0_i32_1 = arith.constant 0 : i32
    return %c0_i32, %c0_i32_0 : i32, i32
  }
  func.func @transform_4(%arg0: i32) -> (i32, i32) {
    %c0_i32 = arith.constant 0 : i32
    %c0_i32_0 = arith.constant 0 : i32
    %c0_i32_1 = arith.constant 0 : i32
    return %c0_i32, %c0_i32_0 : i32, i32
  }
  func.func @transform_5(%arg0: i32) -> (i32, i32) {
    %c0_i32 = arith.constant 0 : i32
    %c0_i32_0 = arith.constant 0 : i32
    %c0_i32_1 = arith.constant 0 : i32
    return %c0_i32, %c0_i32_0 : i32, i32
  }
  func.func @transform_6(%arg0: i32) -> (i32, i32) {
    %c0_i32 = arith.constant 0 : i32
    %c0_i32_0 = arith.constant 0 : i32
    %c0_i32_1 = arith.constant 0 : i32
    return %c0_i32, %c0_i32_0 : i32, i32
  }
  func.func @transform_7(%arg0: i32) -> (i32, i32) {
    %c0_i32 = arith.constant 0 : i32
    %c0_i32_0 = arith.constant 0 : i32
    return %arg0, %c0_i32 : i32, i32
  }
}

module attributes {stable_mosaic.version = 11 : i64} {
  func.func @bottleneck_kernel(%arg0: i32, %arg1: memref<16x128xf32, #tpu.memory_space<vmem>>, %arg2: memref<128x128xbf16, #tpu.memory_space<vmem>>, %arg3: memref<1x128xf32, #tpu.memory_space<vmem>>, %arg4: memref<384x128xbf16, #tpu.memory_space<vmem>>, %arg5: memref<1x128xf32, #tpu.memory_space<vmem>>, %arg6: memref<128x128xbf16, #tpu.memory_space<vmem>>, %arg7: memref<1x128xf32, #tpu.memory_space<vmem>>, %arg8: memref<16x128xf32, #tpu.memory_space<vmem>>) attributes {dimension_semantics = [#tpu.dimension_semantics<parallel>], iteration_bounds = array<i64: 2>, scalar_prefetch = 0 : i64, scratch_operands = 0 : i64, tpu.core_type = #tpu.core_type<tc>, window_params = [{transform_indices = @transform_0, window_bounds = array<i64: 16, 128>}, {pipeline_mode = #tpu.pipeline_mode<synchronous>, transform_indices = @transform_1, window_bounds = array<i64: 128, 128>}, {pipeline_mode = #tpu.pipeline_mode<synchronous>, transform_indices = @transform_2, window_bounds = array<i64: 1, 128>}, {pipeline_mode = #tpu.pipeline_mode<synchronous>, transform_indices = @transform_3, window_bounds = array<i64: 384, 128>}, {pipeline_mode = #tpu.pipeline_mode<synchronous>, transform_indices = @transform_4, window_bounds = array<i64: 1, 128>}, {pipeline_mode = #tpu.pipeline_mode<synchronous>, transform_indices = @transform_5, window_bounds = array<i64: 128, 128>}, {pipeline_mode = #tpu.pipeline_mode<synchronous>, transform_indices = @transform_6, window_bounds = array<i64: 1, 128>}, {transform_indices = @transform_7, window_bounds = array<i64: 16, 128>}]} {
    %c0 = arith.constant 0 : index
    %c0_0 = arith.constant 0 : index
    %0 = vector.load %arg1[%c0, %c0_0] : memref<16x128xf32, #tpu.memory_space<vmem>>, vector<16x128xf32>
    %1 = arith.truncf %0 : vector<16x128xf32> to vector<16x128xbf16>
    %c0_1 = arith.constant 0 : index
    %c0_2 = arith.constant 0 : index
    %2 = vector.load %arg2[%c0_1, %c0_2] : memref<128x128xbf16, #tpu.memory_space<vmem>>, vector<128x128xbf16>
    %cst = arith.constant dense<0.000000e+00> : vector<16x128xf32>
    %3 = tpu.matmul %1, %2, %cst {dimension_numbers = #tpu.dot_dimension_numbers<[1], [0], [0], [1], [0, 0, 1, 1], [], []>} : vector<16x128xbf16>, vector<128x128xbf16>, vector<16x128xf32> -> vector<16x128xf32>
    %c0_3 = arith.constant 0 : index
    %c0_4 = arith.constant 0 : index
    %4 = vector.load %arg3[%c0_3, %c0_4] : memref<1x128xf32, #tpu.memory_space<vmem>>, vector<1x128xf32>
    %5 = vector.broadcast %4 : vector<1x128xf32> to vector<16x128xf32>
    %6 = arith.addf %3, %5 : vector<16x128xf32>
    %cst_5 = arith.constant 0.000000e+00 : f32
    %7 = vector.broadcast %cst_5 : f32 to vector<16x128xf32>
    %8 = arith.maximumf %6, %7 : vector<16x128xf32>
    %9 = tpu.iota {dimensions = array<i32: 0>} : vector<16x1xi32>
    %c16_i32 = arith.constant 16 : i32
    %c0_i32 = arith.constant 0 : i32
    %10 = arith.cmpi eq, %c16_i32, %c0_i32 : i32
    %c1_i32 = arith.constant 1 : i32
    %11 = arith.select %10, %c1_i32, %c16_i32 : i32
    %12 = vector.broadcast %11 : i32 to vector<16x1xi32>
    %13 = arith.remsi %9, %12 : vector<16x1xi32>
    %c0_i32_6 = arith.constant 0 : i32
    %14 = vector.broadcast %c0_i32_6 : i32 to vector<16x1xi32>
    %15 = arith.cmpi ne, %13, %14 : vector<16x1xi32>
    %c0_i32_7 = arith.constant 0 : i32
    %16 = vector.broadcast %c0_i32_7 : i32 to vector<16x1xi32>
    %17 = arith.cmpi slt, %13, %16 : vector<16x1xi32>
    %c0_i32_8 = arith.constant 0 : i32
    %18 = arith.cmpi slt, %11, %c0_i32_8 : i32
    %19 = vector.broadcast %18 : i1 to vector<16x1xi1>
    %20 = vector.broadcast %19 : vector<16x1xi1> to vector<16x1xi1>
    %21 = arith.xori %17, %20 : vector<16x1xi1>
    %22 = arith.andi %21, %15 : vector<16x1xi1>
    %23 = vector.broadcast %11 : i32 to vector<16x1xi32>
    %24 = arith.addi %13, %23 : vector<16x1xi32>
    %25 = arith.select %22, %24, %13 : vector<16x1xi1>, vector<16x1xi32>
    %c0_i32_9 = arith.constant 0 : i32
    %26 = vector.broadcast %c0_i32_9 : i32 to vector<16x1xi32>
    %27 = arith.cmpi eq, %25, %26 : vector<16x1xi32>
    %c1_i32_10 = arith.constant 1 : i32
    %28 = tpu.dynamic_rotate %8 by %c1_i32_10 dim 0 : vector<16x128xf32>, i32 -> vector<16x128xf32>
    %cst_11 = arith.constant 0.000000e+00 : f32
    %29 = vector.shape_cast %27 : vector<16x1xi1> to vector<16x1xi1>
    %30 = vector.broadcast %29 : vector<16x1xi1> to vector<16x128xi1>
    %31 = vector.broadcast %cst_11 : f32 to vector<16x128xf32>
    %32 = arith.select %30, %31, %28 : vector<16x128xi1>, vector<16x128xf32>
    %c15_i32 = arith.constant 15 : i32
    %33 = vector.broadcast %c15_i32 : i32 to vector<16x1xi32>
    %34 = arith.cmpi eq, %25, %33 : vector<16x1xi32>
    %c15_i32_12 = arith.constant 15 : i32
    %35 = tpu.dynamic_rotate %8 by %c15_i32_12 dim 0 : vector<16x128xf32>, i32 -> vector<16x128xf32>
    %cst_13 = arith.constant 0.000000e+00 : f32
    %36 = vector.shape_cast %34 : vector<16x1xi1> to vector<16x1xi1>
    %37 = vector.broadcast %36 : vector<16x1xi1> to vector<16x128xi1>
    %38 = vector.broadcast %cst_13 : f32 to vector<16x128xf32>
    %39 = arith.select %37, %38, %35 : vector<16x128xi1>, vector<16x128xf32>
    %40 = arith.truncf %32 : vector<16x128xf32> to vector<16x128xbf16>
    %c0_14 = arith.constant 0 : index
    %c0_15 = arith.constant 0 : index
    %41 = vector.load %arg4[%c0_14, %c0_15] : memref<384x128xbf16, #tpu.memory_space<vmem>>, vector<128x128xbf16>
    %cst_16 = arith.constant dense<0.000000e+00> : vector<16x128xf32>
    %42 = tpu.matmul %40, %41, %cst_16 {dimension_numbers = #tpu.dot_dimension_numbers<[1], [0], [0], [1], [0, 0, 1, 1], [], []>} : vector<16x128xbf16>, vector<128x128xbf16>, vector<16x128xf32> -> vector<16x128xf32>
    %43 = arith.truncf %8 : vector<16x128xf32> to vector<16x128xbf16>
    %c128 = arith.constant 128 : index
    %c0_17 = arith.constant 0 : index
    %44 = vector.load %arg4[%c128, %c0_17] : memref<384x128xbf16, #tpu.memory_space<vmem>>, vector<128x128xbf16>
    %cst_18 = arith.constant dense<0.000000e+00> : vector<16x128xf32>
    %45 = tpu.matmul %43, %44, %cst_18 {dimension_numbers = #tpu.dot_dimension_numbers<[1], [0], [0], [1], [0, 0, 1, 1], [], []>} : vector<16x128xbf16>, vector<128x128xbf16>, vector<16x128xf32> -> vector<16x128xf32>
    %46 = arith.addf %42, %45 : vector<16x128xf32>
    %47 = arith.truncf %39 : vector<16x128xf32> to vector<16x128xbf16>
    %c256 = arith.constant 256 : index
    %c0_19 = arith.constant 0 : index
    %48 = vector.load %arg4[%c256, %c0_19] : memref<384x128xbf16, #tpu.memory_space<vmem>>, vector<128x128xbf16>
    %cst_20 = arith.constant dense<0.000000e+00> : vector<16x128xf32>
    %49 = tpu.matmul %47, %48, %cst_20 {dimension_numbers = #tpu.dot_dimension_numbers<[1], [0], [0], [1], [0, 0, 1, 1], [], []>} : vector<16x128xbf16>, vector<128x128xbf16>, vector<16x128xf32> -> vector<16x128xf32>
    %50 = arith.addf %46, %49 : vector<16x128xf32>
    %c0_21 = arith.constant 0 : index
    %c0_22 = arith.constant 0 : index
    %51 = vector.load %arg5[%c0_21, %c0_22] : memref<1x128xf32, #tpu.memory_space<vmem>>, vector<1x128xf32>
    %52 = vector.broadcast %51 : vector<1x128xf32> to vector<16x128xf32>
    %53 = arith.addf %50, %52 : vector<16x128xf32>
    %cst_23 = arith.constant 0.000000e+00 : f32
    %54 = vector.broadcast %cst_23 : f32 to vector<16x128xf32>
    %55 = arith.maximumf %53, %54 : vector<16x128xf32>
    %56 = arith.truncf %55 : vector<16x128xf32> to vector<16x128xbf16>
    %c0_24 = arith.constant 0 : index
    %c0_25 = arith.constant 0 : index
    %57 = vector.load %arg6[%c0_24, %c0_25] : memref<128x128xbf16, #tpu.memory_space<vmem>>, vector<128x128xbf16>
    %cst_26 = arith.constant dense<0.000000e+00> : vector<16x128xf32>
    %58 = tpu.matmul %56, %57, %cst_26 {dimension_numbers = #tpu.dot_dimension_numbers<[1], [0], [0], [1], [0, 0, 1, 1], [], []>} : vector<16x128xbf16>, vector<128x128xbf16>, vector<16x128xf32> -> vector<16x128xf32>
    %c0_27 = arith.constant 0 : index
    %c0_28 = arith.constant 0 : index
    %59 = vector.load %arg7[%c0_27, %c0_28] : memref<1x128xf32, #tpu.memory_space<vmem>>, vector<1x128xf32>
    %60 = vector.broadcast %59 : vector<1x128xf32> to vector<16x128xf32>
    %61 = arith.addf %58, %60 : vector<16x128xf32>
    %c0_29 = arith.constant 0 : index
    %c0_30 = arith.constant 0 : index
    %62 = vector.load %arg1[%c0_29, %c0_30] : memref<16x128xf32, #tpu.memory_space<vmem>>, vector<16x128xf32>
    %63 = arith.addf %61, %62 : vector<16x128xf32>
    %cst_31 = arith.constant 0.000000e+00 : f32
    %64 = vector.broadcast %cst_31 : f32 to vector<16x128xf32>
    %65 = arith.maximumf %63, %64 : vector<16x128xf32>
    %c0_32 = arith.constant 0 : index
    %c0_33 = arith.constant 0 : index
    %66 = vector.load %arg8[%c0_32, %c0_33] : memref<16x128xf32, #tpu.memory_space<vmem>>, vector<16x128xf32>
    tpu.vector_store %arg8[%c0_32, %c0_33], %65 {strides = array<i32>} : memref<16x128xf32, #tpu.memory_space<vmem>>, vector<16x128xf32>,
    return
  }
  func.func @transform_0(%arg0: i32) -> (i32, i32) {
    %c0_i32 = arith.constant 0 : i32
    %c0_i32_0 = arith.constant 0 : i32
    return %arg0, %c0_i32 : i32, i32
  }
  func.func @transform_1(%arg0: i32) -> (i32, i32) {
    %c0_i32 = arith.constant 0 : i32
    %c0_i32_0 = arith.constant 0 : i32
    %c0_i32_1 = arith.constant 0 : i32
    return %c0_i32, %c0_i32_0 : i32, i32
  }
  func.func @transform_2(%arg0: i32) -> (i32, i32) {
    %c0_i32 = arith.constant 0 : i32
    %c0_i32_0 = arith.constant 0 : i32
    %c0_i32_1 = arith.constant 0 : i32
    return %c0_i32, %c0_i32_0 : i32, i32
  }
  func.func @transform_3(%arg0: i32) -> (i32, i32) {
    %c0_i32 = arith.constant 0 : i32
    %c0_i32_0 = arith.constant 0 : i32
    %c0_i32_1 = arith.constant 0 : i32
    return %c0_i32, %c0_i32_0 : i32, i32
  }
  func.func @transform_4(%arg0: i32) -> (i32, i32) {
    %c0_i32 = arith.constant 0 : i32
    %c0_i32_0 = arith.constant 0 : i32
    %c0_i32_1 = arith.constant 0 : i32
    return %c0_i32, %c0_i32_0 : i32, i32
  }
  func.func @transform_5(%arg0: i32) -> (i32, i32) {
    %c0_i32 = arith.constant 0 : i32
    %c0_i32_0 = arith.constant 0 : i32
    %c0_i32_1 = arith.constant 0 : i32
    return %c0_i32, %c0_i32_0 : i32, i32
  }
  func.func @transform_6(%arg0: i32) -> (i32, i32) {
    %c0_i32 = arith.constant 0 : i32
    %c0_i32_0 = arith.constant 0 : i32
    %c0_i32_1 = arith.constant 0 : i32
    return %c0_i32, %c0_i32_0 : i32, i32
  }
  func.func @transform_7(%arg0: i32) -> (i32, i32) {
    %c0_i32 = arith.constant 0 : i32
    %c0_i32_0 = arith.constant 0 : i32
    return %arg0, %c0_i32 : i32, i32
  }
}

</mosaic_0001>

<bundles_post_ra>
// kernel: tpu_custom_call.1
= control target key start
LH: loop header
LB: loop body
LE: loop exit
PB: predicated region body
PF: predicated region fallthrough
CT: control target
= control target key end

     0   :  { %12 = vsyncpa [#allocation3], 0  ;;  %s2015_s0 = inlined_call_operand.hbm [shape: f32[32,128], index: 0, kind: input, shape index: {}]   ;;  %s2016_s1 = inlined_call_operand.hbm [shape: bf16[128,128], index: 1, kind: input, shape index: {}]   ;;  %s2017_s2 = inlined_call_operand.vmem [shape: f32[1,128], index: 2, kind: input, shape index: {}]   ;;  %s2018_s3 = inlined_call_operand.hbm [shape: bf16[384,128], index: 3, kind: input, shape index: {}]   ;;  %s2019_s4 = inlined_call_operand.vmem [shape: f32[1,128], index: 4, kind: input, shape index: {}]   ;;  %s2020_s5 = inlined_call_operand.hbm [shape: bf16[128,128], index: 5, kind: input, shape index: {}]   ;;  %s2021_s6 = inlined_call_operand.vmem [shape: f32[1,128], index: 6, kind: input, shape index: {}]   ;;  %s2022_s7 = inlined_call_operand.hbm [shape: f32[32,128], index: 7, kind: output, shape index: {}]  }
   0x1   :  { %14 = vsyncpa [#allocation3 + $0x1], 0 }
   0x2   :  { %15 = vsyncpa [#allocation6], 0 }
   0x3   :  { %16 = vsyncpa [#allocation9], 0 }
   0x4   :  { %17 = vsyncpa [#allocation4], 0 }
   0x5   :  { %19 = vsyncpa [#allocation4 + $0x1], 0  ;;  %s1670_s24 = smov 0   ;;  %s1672_s25 = smov 0  }
   0x6   :  { %s1674_s26 = smov 0   ;;  %s1676_s27 = smov 0  }
   0x7 LB: > { %s1691_s28 = sadd.s32 4294967295, %s1614_s27   ;;  %s1080_s29 = sadd.s32 4294967294, %s1614_s27   ;;  %s1614_s27 = sphi %s1676_s27, %s2048_s27   ;;  %s1610_s26 = sphi %s1674_s26, %s2047_s26   ;;  %s1606_s25 = sphi %s1672_s25, %s2046_s25   ;;  %s1602_s24 = sphi %s1670_s24, %s2045_s24  }
   0x8   : > { %p45_p0 = scmp.ne.s32.totalorder %s1606_s25, %s1602_s24  ;;  %p2023_p1 = scmp.eq.s32.totalorder %s1691_s28, 0 }
   0x9   : > { %p201_p3 = scmp.eq.s32.totalorder %s1080_s29, 1  ;;  %p1081_p5 = scmp.ge.s32.totalorder %s1614_s27, 1 }
   0xa   : > { %p1700_p4 = por %p2023_p1, %p45_p0  ;;  %p208_p7 = scmp.lt.s32.totalorder %s1614_s27, 3 }
   0xb   : > { %p1705_p6 = por %p201_p3, %p45_p0  ;;  %s1616_s10 = smov [#allocation5]  }
   0xc   : > { %s2027_s30 = scalar_select %p1700_p4, 1, 0 }
   0xd   : > { %s2028_s8 = scalar_select %p1705_p6, 1, 0 }
   0xe   : > { %p1710_p8 = pnand %p1081_p5, %p208_p7  ;;  %s220_s11 = sshll.u32 %s1616_s10, 4  ;;  %s1714_s11 = int_to_ptr.vmem [resolvable:$true] %s220_s11 }
   0xf   : > { %2029 = sst [smem:[#allocation15_spill]] %s2028_s8  ;;  %s1617_s13 = smov [#allocation7]  }
  0x10   : > { %s2030_s9 = scalar_select %p1710_p8, 1, 0 }
  0x11   : > { %p1316_p9 = pneg %p1710_p8  ;;  %s236_s14 = sshll.u32 %s1617_s13, 4  ;;  %s1725_s14 = int_to_ptr.vmem [resolvable:$true] %s236_s14 }
  0x12   : > { %s1618_s15 = smov [#allocation8]   ;;  %s1426_s19 = scalar_lea.hbm %s2016_s1, 1024 }
  0x13   : > { %p1721_p11 = pnand %p1316_p9, %p2023_p1  ;;  %s1727_s16 = sshll.u32 %s1618_s15, 4  ;;  %s253_s16 = int_to_ptr.vmem [resolvable:$true] %s1727_s16 }
  0x14   : > { %p1427_p12 = scmp.ne.s32.totalorder %s2016_s1, %s1426_s19  ;;  %p1433_p5 = scmp.lt.u32.totalorder %s1426_s19, %s2016_s1 }
  0x15   : > { %p1737_p13 = pneg %p1721_p11 }
  0x17   : > { %p1429_p0 = pnand %p1737_p13, %p1427_p12 }
  0x19   : > { %p1430_p3 = pneg %p1429_p0 }
  0x1b   : > { %p1435_p7 = pnand %p1433_p5, %p1430_p3 }
  0x1d   : > { %1438 = shalt.err (!%p1435_p7)
}
  0x1e   : > { %s1439_s10 = scalar_lea.vmem %s1714_s11, 1024  ;;  %p1447_p2 = scmp.lt.s32.totalorder %s1714_s11, %s1714_s11 }
  0x1f   : > { %p1440_p9 = scmp.ne.s32.totalorder %s1714_s11, %s1439_s10  ;;  %p1448_p6 = scmp.lt.s32.totalorder %s1439_s10, %s1439_s10 }
  0x21   : > { %p1442_p10 = pnand %p1440_p9, %p1737_p13  ;;  %p1449_p12 = por %p1448_p6, %p1447_p2 }
  0x23   : > { %p1443_p1 = pneg %p1442_p10 }
  0x25   : > { %p1450_p0 = pnand %p1449_p12, %p1443_p1 }
  0x27   : > { %1453 = shalt.err (!%p1450_p0)
}
  0x28   : > { %s1619_s13 = smov 64   ;;  %s1620_s15 = smov 4  }
  0x29   : > { %1319 = dma.hbm_to_vmem [thread:$0]  (!%p1721_p11), %s2016_s1, 1024, %s1714_s11, [#allocation6], %s1619_s13, %s1619_s13, %s1620_s15  }
  0x2a   : > { %s1454_s21 = scalar_lea.hbm %s2018_s3, 3072 }
  0x2b   : > { %p1455_p1 = scmp.ne.s32.totalorder %s2018_s3, %s1454_s21  ;;  %p1461_p10 = scmp.lt.u32.totalorder %s1454_s21, %s2018_s3 }
  0x2d   : > { %p1457_p2 = pnand %p1455_p1, %p1737_p13 }
  0x2f   : > { %p1458_p6 = pneg %p1457_p2 }
  0x31   : > { %p1463_p3 = pnand %p1461_p10, %p1458_p6 }
  0x33   : > { %1466 = shalt.err (!%p1463_p3)
}
  0x34   : > { %s1467_s11 = scalar_lea.vmem %s1725_s14, 3072  ;;  %p1475_p12 = scmp.lt.s32.totalorder %s1725_s14, %s1725_s14 }
  0x35   : > { %p1468_p5 = scmp.ne.s32.totalorder %s1725_s14, %s1467_s11  ;;  %p1476_p0 = scmp.lt.s32.totalorder %s1467_s11, %s1467_s11 }
  0x37   : > { %p1470_p7 = pnand %p1468_p5, %p1737_p13  ;;  %p1477_p1 = por %p1476_p0, %p1475_p12 }
  0x39   : > { %p1471_p9 = pneg %p1470_p7 }
  0x3b   : > { %p1478_p2 = pnand %p1477_p1, %p1471_p9 }
  0x3d   : > { %1481 = shalt.err (!%p1478_p2)
}
  0x3e   : > { %1322 = dma.hbm_to_vmem [thread:$0]  (!%p1721_p11), %s2018_s3, 3072, %s1725_s14, [#allocation6], %s1619_s13, %s1619_s13, %s1620_s15  }
  0x3f   : > { %s1482_s20 = scalar_lea.hbm %s2020_s5, 1024 }
  0x40   : > { %p1483_p6 = scmp.ne.s32.totalorder %s2020_s5, %s1482_s20  ;;  %p1489_p5 = scmp.lt.u32.totalorder %s1482_s20, %s2020_s5 }
  0x42   : > { %p1485_p10 = pnand %p1483_p6, %p1737_p13 }
  0x44   : > { %p1486_p3 = pneg %p1485_p10 }
  0x46   : > { %p1491_p7 = pnand %p1489_p5, %p1486_p3 }
  0x48   : > { %1494 = shalt.err (!%p1491_p7)
}
  0x49   : > { %s1495_s11 = scalar_lea.vmem %s253_s16, 1024  ;;  %p1503_p1 = scmp.lt.s32.totalorder %s253_s16, %s253_s16 }
  0x4a   : > { %p1496_p9 = scmp.ne.s32.totalorder %s253_s16, %s1495_s11  ;;  %p1504_p2 = scmp.lt.s32.totalorder %s1495_s11, %s1495_s11 }
  0x4c   : > { %p1498_p12 = pnand %p1496_p9, %p1737_p13  ;;  %p1505_p4 = por %p1504_p2, %p1503_p1 }
  0x4e   : > { %p1499_p0 = pneg %p1498_p12 }
  0x50   : > { %p1506_p8 = pnand %p1505_p4, %p1499_p0 }
  0x52   : > { %1509 = shalt.err (!%p1506_p8)
}
  0x53   : > { %1325 = dma.hbm_to_vmem [thread:$0]  (!%p1721_p11), %s2020_s5, 1024, %s253_s16, [#allocation9], %s1619_s13, %s1619_s13, %s1620_s15  }
  0x54   : > { %s1810_s22 = sadd.s32 1, %s1614_s27   ;;  %s32_s17 = sadd.s32 1, %s1610_s26 }
  0x55   : > { %s29_s12 = ssub.s32 %s1614_s27, %s1810_s22  ;;  %p39_p8 = scmp.ne.s32.totalorder %s1610_s26, %s1606_s25 }
  0x56   : > { %p30_p4 = scmp.eq.s32.totalorder %s29_s12, 0  ;;  %p40_p13 = scmp.eq.s32.totalorder %s1614_s27, 0 }
  0x57   : > { %p1337_p6 = scmp.lt.s32.totalorder %s1614_s27, 2  ;;  %p2033_p3 = scmp.eq.s32.totalorder %s1691_s28, 1 }
  0x58   : > { %s1820_s18 = scalar_select %p30_p4, %s1610_s26, %s32_s17  }
  0x59   : > { %p41_p10 = por %p40_p13, %p39_p8  ;;  %p1824_p5 = por %p2033_p3, %p39_p8 }
  0x5a   : > { %s269_s20 = sand.u32 1, %s1610_s26   ;;  %s1151_s21 = sshll.u32 %s1614_s27, 8 }
  0x5b   : > { %s1086_s16 = sshll.u32 %s269_s20, 4  ;;  %s1833_s23 = scalar_lea.hbm %s2015_s0, %s1151_s21 }
  0x5c   : > { %s273_s29 = scalar_lea.vmem [#allocation2], %s1086_s16  ;;  %p1835_p11 = pnand %p1337_p6, %p41_p10 }
  0x5d   : > { %s280_s10 = sshll.u32 %s273_s29, 4  ;;  %s1841_s14 = scalar_lea.sflag [#allocation3], %s269_s20  ;;  %s1839_s10 = int_to_ptr.vmem [resolvable:$true] %s280_s10 }
  0x5e   : > { %s1510_s8 = scalar_lea.hbm %s1833_s23, 256  ;;  %p1512_p9 = pneg %p1835_p11 }
  0x5f   : > { %p1511_p7 = scmp.ne.s32.totalorder %s1833_s23, %s1510_s8  ;;  %s1515_s21 = scalar_lea.hbm %s2015_s0, 512 }
  0x60   : > { %p1516_p1 = scmp.lt.u32.totalorder %s1833_s23, %s2015_s0  ;;  %p1517_p2 = scmp.lt.u32.totalorder %s1515_s21, %s1510_s8 }
  0x61   : > { %p1513_p12 = pnand %p1512_p9, %p1511_p7  ;;  %p1519_p8 = scmp.lt.u32.totalorder %s1510_s8, %s1833_s23 }
  0x62   : > { %p1518_p4 = por %p1517_p2, %p1516_p1 }
  0x63   : > { %p1514_p0 = pneg %p1513_p12 }
  0x64   : > { %p1520_p13 = por %p1519_p8, %p1518_p4 }
  0x66   : > { %p1521_p6 = pnand %p1520_p13, %p1514_p0 }
  0x68   : > { %1524 = shalt.err (!%p1521_p6)
}
  0x69   : > { %s1525_s20 = scalar_lea.vmem %s1839_s10, 256  ;;  %s1621_s15 = smov [#allocation2]  }
  0x6a   : > { %p1526_p10 = scmp.ne.s32.totalorder %s1839_s10, %s1525_s20  ;;  %s1530_s29 = sshll.u32 %s1621_s15, 4  ;;  %s1531_s29 = int_to_ptr.vmem [resolvable:$false] %s1530_s29 }
  0x6b   : > { %s1532_s12 = scalar_lea.vmem %s1531_s29, 512  ;;  %p1533_p12 = scmp.lt.s32.totalorder %s1839_s10, %s1531_s29 }
  0x6c   : > { %p1528_p3 = pnand %p1526_p10, %p1512_p9  ;;  %p1534_p1 = scmp.lt.s32.totalorder %s1532_s12, %s1525_s20 }
  0x6e   : > { %p1529_p7 = pneg %p1528_p3  ;;  %p1535_p2 = por %p1534_p1, %p1533_p12 }
  0x70   : > { %p1536_p4 = pnand %p1535_p2, %p1529_p7 }
  0x72   : > { %1539 = shalt.err (!%p1536_p4)
}
  0x73   : > { %s1622_s8 = smov 128   ;;  %s1623_s17 = smov 8  }
  0x74   : > { %1329 = dma.hbm_to_vmem [thread:$0]  (!%p1835_p11), %s1833_s23, 256, %s1839_s10, %s1841_s14, %s1622_s8, %s1622_s8, %s1623_s17  }
  0x75   : > { %p2036_p9 = scmp.ne.s32.totalorder %s2030_s9, 0 }
  0x76   : > { %s1872_s21 = sand.u32 (!%p2036_p9), 1, %s1606_s25   ;;  %p2037_p0 = scmp.ne.s32.totalorder (!%p2036_p9), %s2027_s30, 0 }
  0x77   : > { %292 = sbr.rel (%p2036_p9) target bundleno = 877 (0x36d), region = 48  ;;  %s1090_s16 = sshll.u32 (!%p2036_p9), %s1872_s21, 4 }
  0x78   : > { %s295_s13 = scalar_lea.sflag (!%p2036_p9), [#allocation3], %s1872_s21  ;;  %s1878_s20 = scalar_lea.vmem (!%p2036_p9), [#allocation2], %s1090_s16 }
  0x7e   : > { %1585 = dma.done.wait (%p2037_p0), %s295_s13, 256  }
  0x7f   : > { %1587 = vsyncadd (%p2037_p0), %s295_s13, 4294967040  ;;  %p2038_p11 = scmp.eq.s32.totalorder %s1691_s28, 0 }
  0x81   : > { %1589 = dma.done.wait (%p2038_p11), [#allocation6], 4096   ;;  %p2039_p8 = pmov %p2038_p11 }
  0x83   : > { %1591 = vsyncadd (%p2039_p8), [#allocation6], 4294963200  ;;  %p2040_p13 = pmov %p2039_p8 }
  0x84   : > { %p2041_p6 = pmov %p2039_p8 }
  0x85   : > { %1593 = dma.done.wait (%p2040_p13), [#allocation9], 1024  }
  0x86   : > { %1595 = vsyncadd (%p2041_p6), [#allocation9], 4294966272  ;;  %v1624_v0 = vmov 0.0   ;;  %vm1625_vm0 = vmmov 0   ;;  %v1386_v1 = vld [vmem:[#allocation5] sm:$0xff]   ;;  %v1387_v2 = vld [vmem:[#allocation5 + $0x8] sm:$0xff]   ;;  %v461_v28 = vlaneseq }
  0x87   : > { %1200 = vmatprep.subr.bf16.mxu0 %v1624_v0  ;;  %1216 = vmatprep.mubr.msk.bf16.mxu0 %vm1625_vm0, %v1624_v0  ;;  %v1388_v3 = vld [vmem:[#allocation5 + $0x10] sm:$0xff]   ;;  %v1394_v4 = vld [vmem:[#allocation7 + $0x40] sm:$0xff]   ;;  %v1389_v5 = vld [vmem:[#allocation5 + $0x18] sm:$0xff]   ;;  %vm1626_vm4 = vmmov 1   ;;  %s340_s15 = scalar_lea.vmem [#allocation10], %s1090_s16  ;;  %s1152_s12 = sshll.u32 %s1691_s28, 8 }
  0x88   : > { %1220 = vmatprep.subr.bf16.mxu1 %v1624_v0  ;;  %1236 = vmatprep.mubr.msk.bf16.mxu1 %vm1625_vm0, %v1624_v0  ;;  %v1395_v6 = vld [vmem:[#allocation7 + $0x48] sm:$0xff]   ;;  %v1390_v7 = vld [vmem:[#allocation5 + $0x20] sm:$0xff]   ;;  %v1397_v8 = vld [vmem:[#allocation7 + $0x50] sm:$0xff]   ;;  %v462_v30 = vshrl.u32 %v461_v28, 7  ;;  %s978_s29 = sshll.u32 %s340_s15, 4  ;;  %s1971_s16 = scalar_lea.hbm %s2022_s7, %s1152_s12  ;;  %s1965_s29 = int_to_ptr.vmem [resolvable:$true] %s978_s29 }
  0x89   : > { %1201 = vmatpush3.bf16.msra.mxu0 %v1386_v1  ;;  %1221 = vmatpush3.bf16.msra.mxu1 %v1394_v4  ;;  %v1391_v9 = vld [vmem:[#allocation5 + $0x28] sm:$0xff]   ;;  %v1399_v10 = vld [vmem:[#allocation7 + $0x58] sm:$0xff]   ;;  %v1392_v11 = vld [vmem:[#allocation5 + $0x30] sm:$0xff]   ;;  %s965_s13 = scalar_lea.sflag [#allocation4], %s1872_s21  ;;  %s1627_s28 = smov [#allocation10]  }
  0x8a   : > { %1202 = vmatprep.subr.bf16.mxu0 %v1624_v0  ;;  %1222 = vmatprep.subr.bf16.mxu1 %v1624_v0  ;;  %v1401_v12 = vld [vmem:[#allocation7 + $0x60] sm:$0xff]   ;;  %v1393_v13 = vld [vmem:[#allocation5 + $0x38] sm:$0xff]   ;;  %v1403_v16 = vld [vmem:[#allocation7 + $0x68] sm:$0xff]   ;;  %v468_v35 = vand.u32 15, %v462_v30  ;;  %vm492_vm1 = vcmp.lt.s32.totalorder %v462_v30, 1  ;;  %vm505_vm2 = vcmp.lt.s32.totalorder %v462_v30, 7 }
  0x8b   : > { %v1908_v14 = vld [vmem:[%s1878_s20] sm:$0xff]  ;;  %v1911_v15 = vld [vmem:[%s1878_s20 + $0x8] sm:$0xff]  ;;  %v463_v57 = vadd.s32 8, %v462_v30  ;;  %s1540_s20 = scalar_lea.vmem %s1965_s29, 256  ;;  %s1544_s30 = sshll.u32 %s1627_s28, 4  ;;  %s1545_s30 = int_to_ptr.vmem [resolvable:$false] %s1544_s30 }
  0x8c   : > { %v1396_v17 = vld [vmem:[#allocation7] sm:$0xff]   ;;  %v346_v18 = vpack.c.bf16 %v1911_v15, %v1908_v14  ;;  %v1398_v19 = vld [vmem:[#allocation7 + $0x8] sm:$0xff]   ;;  %v1400_v20 = vld [vmem:[#allocation7 + $0x10] sm:$0xff]   ;;  %vm1153_vm3 = vcmp.ne.s32.totalorder %v468_v35, 0  ;;  %p1541_p10 = scmp.ne.s32.totalorder %s1965_s29, %s1540_s20  ;;  %s1546_s9 = scalar_lea.vmem %s1545_s30, 512 }
  0x8d   : > { %1203 = vmatpush3.bf16.msra.mxu0 %v1387_v2  ;;  %1223 = vmatpush3.bf16.msra.mxu1 %v1395_v6  ;;  %v1402_v21 = vld [vmem:[#allocation7 + $0x18] sm:$0xff]   ;;  %v1404_v22 = vld [vmem:[#allocation7 + $0x20] sm:$0xff]   ;;  %v1405_v23 = vld [vmem:[#allocation7 + $0x70] sm:$0xff]   ;;  %v475_v59 = vand.u32 15, %v463_v57  ;;  %p1547_p12 = scmp.lt.s32.totalorder %s1965_s29, %s1545_s30  ;;  %p1548_p1 = scmp.lt.s32.totalorder %s1546_s9, %s1540_s20 }
  0x8e   : > { %1204 = vmatprep.subr.bf16.mxu0 %v1624_v0  ;;  %1224 = vmatprep.subr.bf16.mxu1 %v1624_v0  ;;  %v1406_v24 = vld [vmem:[#allocation7 + $0x28] sm:$0xff]   ;;  %v1407_v25 = vld [vmem:[#allocation7 + $0x78] sm:$0xff]   ;;  %v1408_v26 = vld [vmem:[#allocation7 + $0x30] sm:$0xff]   ;;  %p1542_p3 = pnand %p1541_p10, %p1824_p5 }
  0x8f   : > { %v1409_v27 = vld [vmem:[#allocation7 + $0x38] sm:$0xff]   ;;  %v1095_v29 = vld [vmem:[%s2017_s2] ss:$0 sm:$0xff]  ;;  %vm1121_vm5 = vmpackc.low %vm1626_vm4, %vm1153_vm3  ;;  %vm1154_vm6 = vcmp.ne.s32.totalorder %v475_v59, 15  ;;  %p1549_p2 = por %p1548_p1, %p1547_p12 }
  0x90   : > { %v1410_v41 = vld [vmem:[#allocation7 + $0x80] sm:$0xff]   ;;  %v1411_v52 = vld [vmem:[#allocation7 + $0x88] sm:$0xff]   ;;  %v1412_v53 = vld [vmem:[#allocation7 + $0x90] sm:$0xff]   ;;  %p1543_p7 = pneg %p1542_p3 }
  0x91   : > { %1205 = vmatpush3.bf16.msra.mxu0 %v1388_v3  ;;  %1225 = vmatpush3.bf16.msra.mxu1 %v1397_v8  ;;  %v1413_v54 = vld [vmem:[#allocation7 + $0x98] sm:$0xff]   ;;  %v1414_v55 = vld [vmem:[#allocation7 + $0xa0] sm:$0xff]   ;;  %v1415_v56 = vld [vmem:[#allocation7 + $0xa8] sm:$0xff]  }
  0x92   : > { %1206 = vmatprep.subr.bf16.mxu0 %v1624_v0  ;;  %1226 = vmatprep.subr.bf16.mxu1 %v1624_v0  ;;  %v1416_v58 = vld [vmem:[#allocation7 + $0xb0] sm:$0xff]   ;;  %v1417_v60 = vld [vmem:[#allocation7 + $0xb8] sm:$0xff]   ;;  %vm1133_vm7 = vmpackc.low %vm1154_vm6, %vm1626_vm4  ;;  %p1550_p4 = pnand %p1549_p2, %p1543_p7 }
  0x93   : > { %v1418_v61 = vld [vmem:[#allocation8] sm:$0xff]   ;;  %v1419_v62 = vld [vmem:[#allocation8 + $0x8] sm:$0xff]   ;;  %v1420_v63 = vld [vmem:[#allocation8 + $0x10] sm:$0xff]  }
  0x94   : > { %v1421_v1 = vld [vmem:[#allocation8 + $0x18] sm:$0xff]   ;;  %v1422_v2 = vld [vmem:[#allocation8 + $0x20] sm:$0xff]   ;;  %v1423_v3 = vld [vmem:[#allocation8 + $0x28] sm:$0xff]  }
  0x95   : > { %1207 = vmatpush3.bf16.msra.mxu0 %v1389_v5  ;;  %1227 = vmatpush3.bf16.msra.mxu1 %v1399_v10  ;;  %v1424_v4 = vld [vmem:[#allocation8 + $0x30] sm:$0xff]   ;;  %v1425_v5 = vld [vmem:[#allocation8 + $0x38] sm:$0xff]  }
  0x96   : > { %1208 = vmatprep.subr.bf16.mxu0 %v1624_v0  ;;  %1228 = vmatprep.subr.bf16.mxu1 %v1624_v0 }
  0x99   : > { %1209 = vmatpush3.bf16.msra.mxu0 %v1390_v7  ;;  %1229 = vmatpush3.bf16.msra.mxu1 %v1401_v12 }
  0x9a   : > { %1210 = vmatprep.subr.bf16.mxu0 %v1624_v0  ;;  %1230 = vmatprep.subr.bf16.mxu1 %v1624_v0 }
  0x9d   : > { %1211 = vmatpush3.bf16.msra.mxu0 %v1391_v9  ;;  %1231 = vmatpush3.bf16.msra.mxu1 %v1403_v16 }
  0x9e   : > { %1212 = vmatprep.subr.bf16.mxu0 %v1624_v0  ;;  %1232 = vmatprep.subr.bf16.mxu1 %v1624_v0 }
  0xa1   : > { %1213 = vmatpush3.bf16.msra.mxu0 %v1392_v11  ;;  %1233 = vmatpush3.bf16.msra.mxu1 %v1405_v23 }
  0xa2   : > { %1214 = vmatprep.subr.bf16.mxu0 %v1624_v0  ;;  %1234 = vmatprep.subr.bf16.mxu1 %v1624_v0 }
  0xa5   : > { %1215 = vmatpush3.bf16.msra.mxu0 %v1393_v13  ;;  %1235 = vmatpush3.bf16.msra.mxu1 %v1407_v25 }
  0xa6   : > { %1240 = vmatprep.subr.bf16.mxu0 %v1624_v0  ;;  %1260 = vmatprep.subr.bf16.mxu1 %v1624_v0 }
  0xa8   : > { %1217 = vmatmul.mubr.bf16.vlgmr.msra.gmra.mrb[0].mxu0 %v346_v18 }
  0xa9   : > { %1241 = vmatpush3.bf16.msra.mxu0 %v1396_v17  ;;  %1256 = vmatprep.mubr.msk.bf16.mxu0 %vm1625_vm0, %v1624_v0 }
  0xaa   : > { %1242 = vmatprep.subr.bf16.mxu0 %v1624_v0 }
  0xad   : > { %1243 = vmatpush3.bf16.msra.mxu0 %v1398_v19  ;;  %v1136_v19 = vld [vmem:[%s2019_s4] ss:$0 sm:$0xff] }
  0xae   : > { %1244 = vmatprep.subr.bf16.mxu0 %v1624_v0 }
  0xb1   : > { %1245 = vmatpush3.bf16.msra.mxu0 %v1400_v20 }
  0xb2   : > { %1246 = vmatprep.subr.bf16.mxu0 %v1624_v0 }
  0xb5   : > { %1247 = vmatpush3.bf16.msra.mxu0 %v1402_v21 }
  0xb6   : > { %1248 = vmatprep.subr.bf16.mxu0 %v1624_v0 }
  0xb9   : > { %1249 = vmatpush3.bf16.msra.mxu0 %v1404_v22 }
  0xba   : > { %1250 = vmatprep.subr.bf16.mxu0 %v1624_v0 }
  0xbd   : > { %1251 = vmatpush3.bf16.msra.mxu0 %v1406_v24 }
  0xbe   : > { %1252 = vmatprep.subr.bf16.mxu0 %v1624_v0 }
  0xc1   : > { %1253 = vmatpush3.bf16.msra.mxu0 %v1408_v26 }
  0xc2   : > { %1254 = vmatprep.subr.bf16.mxu0 %v1624_v0 }
  0xc5   : > { %1255 = vmatpush3.bf16.msra.mxu0 %v1409_v27 }
  0xc6   : > { %1280 = vmatprep.subr.bf16.mxu0 %v1624_v0 }
 0x17b   : > { %v452_v31 = vpop.f32.mrb[0].mxu0 }
 0x17c   : > { %v453_v32 = vadd.f32 %v1095_v29, %v452_v31  ;;  %v1218_v33 = vpop.f32.mrb[1].mxu0 }
 0x17d   : > { %v455_v34 = vpop.f32.mrb[2].mxu0 }
 0x17e   : > { %v459_v36 = vmax.f32 %v453_v32, 0.0  ;;  %v456_v37 = vadd.f32 %v1095_v29, %v455_v34  ;;  %v1219_v38 = vpop.f32.mrb[3].mxu0  ;;  %v1137_v29 = vld [vmem:[%s2021_s6] ss:$0 sm:$0xff] }
 0x180   : > { %v460_v39 = vmax.f32 %v456_v37, 0.0  ;;  %v490_v40 = vrot.slane %v459_v36, 7  ;;  %v503_v42 = vrot.slane %v459_v36, 1 }
 0x182   : > { %v491_v43 = vrot.slane %v460_v39, 7  ;;  %v504_v44 = vrot.slane %v460_v39, 1  ;;  %v531_v45 = vpack.c.bf16 %v460_v39, %v459_v36 }
 0x184   : > { %v493_v46 = vsel %vm492_vm1, %v490_v40, %v491_v43  ;;  %v494_v47 = vsel %vm492_vm1, %v491_v43, %v490_v40  ;;  %v506_v48 = vsel %vm505_vm2, %v503_v42, %v504_v44  ;;  %v507_v49 = vsel %vm505_vm2, %v504_v44, %v503_v42  ;;  %1237 = vmatmul.mubr.bf16.vlgmr.msra.gmra.mrb[0].mxu1 %v531_v45 }
 0x185   : > { %v1122_v50 = vpack.c.bf16 %v493_v46, %v494_v47  ;;  %v1134_v51 = vpack.c.bf16 %v507_v49, %v506_v48  ;;  %1261 = vmatpush3.bf16.msra.mxu1 %v1410_v41  ;;  %1276 = vmatprep.mubr.msk.bf16.mxu1 %vm1625_vm0, %v1624_v0 }
 0x186   : > { %1262 = vmatprep.subr.bf16.mxu1 %v1624_v0 }
 0x187   : > { %1257 = vmatmul.mubr.msk.bf16.vlgmr.msra.gmra.mrb[4].mxu0 %vm1121_vm5, %v1122_v50 }
 0x188   : > { %1296 = vmatprep.mubr.msk.bf16.mxu0 %vm1625_vm0, %v1624_v0  ;;  %1281 = vmatpush3.bf16.msra.mxu0 %v1418_v61 }
 0x189   : > { %1263 = vmatpush3.bf16.msra.mxu1 %v1411_v52  ;;  %1282 = vmatprep.subr.bf16.mxu0 %v1624_v0 }
 0x18a   : > { %1264 = vmatprep.subr.bf16.mxu1 %v1624_v0 }
 0x18c   : > { %1283 = vmatpush3.bf16.msra.mxu0 %v1419_v62 }
 0x18d   : > { %1265 = vmatpush3.bf16.msra.mxu1 %v1412_v53  ;;  %1284 = vmatprep.subr.bf16.mxu0 %v1624_v0 }
 0x18e   : > { %1266 = vmatprep.subr.bf16.mxu1 %v1624_v0 }
 0x190   : > { %1285 = vmatpush3.bf16.msra.mxu0 %v1420_v63 }
 0x191   : > { %1267 = vmatpush3.bf16.msra.mxu1 %v1413_v54  ;;  %1286 = vmatprep.subr.bf16.mxu0 %v1624_v0 }
 0x192   : > { %1268 = vmatprep.subr.bf16.mxu1 %v1624_v0 }
 0x194   : > { %1287 = vmatpush3.bf16.msra.mxu0 %v1421_v1 }
 0x195   : > { %1269 = vmatpush3.bf16.msra.mxu1 %v1414_v55  ;;  %1288 = vmatprep.subr.bf16.mxu0 %v1624_v0 }
 0x196   : > { %1270 = vmatprep.subr.bf16.mxu1 %v1624_v0 }
 0x198   : > { %1289 = vmatpush3.bf16.msra.mxu0 %v1422_v2 }
 0x199   : > { %1271 = vmatpush3.bf16.msra.mxu1 %v1415_v56  ;;  %1290 = vmatprep.subr.bf16.mxu0 %v1624_v0 }
 0x19a   : > { %1272 = vmatprep.subr.bf16.mxu1 %v1624_v0 }
 0x19c   : > { %1291 = vmatpush3.bf16.msra.mxu0 %v1423_v3 }
 0x19d   : > { %1273 = vmatpush3.bf16.msra.mxu1 %v1416_v58  ;;  %1292 = vmatprep.subr.bf16.mxu0 %v1624_v0 }
 0x19e   : > { %1274 = vmatprep.subr.bf16.mxu1 %v1624_v0 }
 0x1a0   : > { %1293 = vmatpush3.bf16.msra.mxu0 %v1424_v4 }
 0x1a1   : > { %1275 = vmatpush3.bf16.msra.mxu1 %v1417_v60  ;;  %1294 = vmatprep.subr.bf16.mxu0 %v1624_v0 }
 0x1a4   : > { %1277 = vmatmul.mubr.msk.bf16.vlgmr.msra.gmra.mrb[4].mxu1 %vm1133_vm7, %v1134_v51  ;;  %1295 = vmatpush3.bf16.msra.mxu0 %v1425_v5 }
 0x257   : > { %v630_v6 = vpop.f32.mrb[0].mxu1 }
 0x258   : > { %v1238_v7 = vpop.f32.mrb[1].mxu1 }
 0x259   : > { %v633_v8 = vpop.f32.mrb[2].mxu1 }
 0x25a   : > { %v1239_v9 = vpop.f32.mrb[3].mxu1  ;;  %v719_v10 = vpop.f32.mrb[4].mxu0 }
 0x25b   : > { %v720_v11 = vadd.f32 %v719_v10, %v630_v6  ;;  %v1258_v12 = vpop.f32.mrb[5].mxu0 }
 0x25c   : > { %v722_v13 = vpop.f32.mrb[6].mxu0 }
 0x25d   : > { %v723_v16 = vadd.f32 %v722_v13, %v633_v8  ;;  %v1259_v17 = vpop.f32.mrb[7].mxu0 }
 0x277   : > { %v825_v18 = vpop.f32.mrb[4].mxu1 }
 0x278   : > { %v832_v20 = vadd.f32 %v825_v18, %v720_v11  ;;  %v1278_v0 = vpop.f32.mrb[5].mxu1 }
 0x279   : > { %v828_v21 = vpop.f32.mrb[6].mxu1 }
 0x27a   : > { %v841_v22 = vadd.f32 %v1136_v19, %v832_v20  ;;  %v833_v23 = vadd.f32 %v828_v21, %v723_v16  ;;  %v1279_v24 = vpop.f32.mrb[7].mxu1 }
 0x27c   : > { %v842_v25 = vadd.f32 %v1136_v19, %v833_v23  ;;  %v843_v26 = vmax.f32 %v841_v22, 0.0 }
 0x27e   : > { %v844_v27 = vmax.f32 %v842_v25, 0.0 }
 0x280   : > { %v845_v28 = vpack.c.bf16 %v844_v27, %v843_v26 }
 0x282   : > { %1297 = vmatmul.mubr.bf16.vlgmr.msra.gmra.mrb[8].mxu0 %v845_v28 }
 0x355   : > { %v951_v30 = vpop.f32.mrb[8].mxu0 }
 0x356   : > { %v952_v31 = vadd.f32 %v1137_v29, %v951_v30  ;;  %v1298_v32 = vpop.f32.mrb[9].mxu0 }
 0x357   : > { %v954_v33 = vpop.f32.mrb[10].mxu0 }
 0x358   : > { %v958_v34 = vadd.f32 %v952_v31, %v1908_v14  ;;  %v955_v35 = vadd.f32 %v1137_v29, %v954_v33  ;;  %v1299_v36 = vpop.f32.mrb[11].mxu0 }
 0x35a   : > { %v960_v37 = vmax.f32 %v958_v34, 0.0  ;;  %v959_v38 = vadd.f32 %v955_v35, %v1911_v15 }
 0x35c   : > { %962 = vst [vmem:[%s340_s15] sm:$0xff] %v960_v37  ;;  %v961_v39 = vmax.f32 %v959_v38, 0.0 }
 0x35e   : > { %963 = vst [vmem:[%s340_s15 + $0x8] sm:$0xff] %v961_v39 }
 0x35f   : > { %1553 = shalt.err (!%p1550_p4)
}
 0x360   : > { %s1554_s23 = scalar_lea.hbm %s1971_s16, 256  ;;  %s1558_s14 = scalar_lea.hbm %s2022_s7, 512 }
 0x361   : > { %p1555_p9 = scmp.ne.s32.totalorder %s1971_s16, %s1554_s23  ;;  %p1559_p8 = scmp.lt.u32.totalorder %s1971_s16, %s2022_s7 }
 0x362   : > { %p1560_p13 = scmp.lt.u32.totalorder %s1558_s14, %s1554_s23  ;;  %p1562_p10 = scmp.lt.u32.totalorder %s1554_s23, %s1971_s16 }
 0x363   : > { %p1556_p0 = pnand %p1555_p9, %p1824_p5 }
 0x364   : > { %p1561_p6 = por %p1560_p13, %p1559_p8 }
 0x365   : > { %p1557_p11 = pneg %p1556_p0 }
 0x366   : > { %p1563_p3 = por %p1562_p10, %p1561_p6 }
 0x368   : > { %p1564_p7 = pnand %p1563_p3, %p1557_p11 }
 0x36a   : > { %1567 = shalt.err (!%p1564_p7)
}
 0x36b   : > { %s1628_s8 = smov 128   ;;  %s1629_s17 = smov 8  }
 0x36c   : > { %1314 = dma.vmem_to_hbm [thread:$0]  (%p1824_p5), %s1965_s29, 256, %s1971_s16, %s965_s13, %s1628_s8, %s1628_s8, %s1629_s17  }
 0x36d PF: > { %s2042_s20 = sld [smem:[#allocation15_spill]]  ;;  %s993_s28 = sand.u32 1, %s1602_s24  }
 0x36e   : > { %p2044_p1 = scmp.ge.s32.totalorder %s1614_s27, 2  ;;  %s994_s30 = scalar_lea.sflag [#allocation4], %s993_s28 }
 0x373   : > { %p2043_p12 = scmp.ne.s32.totalorder %s2042_s20, 0 }
 0x375   : > { %p1331_p2 = pnand %p2044_p1, %p2043_p12 }
 0x377   : > { %1597 = dma.done.wait (!%p1331_p2), %s994_s30, 256  }
 0x378   : > { %1599 = vsyncadd (!%p1331_p2), %s994_s30, 4294967040  ;;  %p22_p4 = scmp.ge.s32.totalorder %s1810_s22, 4   ;;  %s2045_s24 = smov %s1606_s25 }
 0x379   : > { %s2046_s25 = smov %s1610_s26  ;;  %s2047_s26 = smov %s1820_s18 }
 0x37a   : > { %s2048_s27 = smov %s1810_s22  ;;  %24 = sbr.rel (!%p22_p4) target bundleno = 7 (0x7), region = 105 }
 0x381   :  { %999 = vsyncpa [#allocation3], 1 }
 0x382   :  { %1001 = vsyncpa [#allocation3 + $0x1], 1 }
 0x383   :  { %1002 = vsyncpa [#allocation6], 1 }
 0x384   :  { %1003 = vsyncpa [#allocation9], 1 }
 0x385   :  { %1004 = vsyncpa [#allocation4], 1 }
 0x386   :  { %1006 = vsyncpa [#allocation4 + $0x1], 1 }

// kernel: tpu_custom_call.1
= control target key start
LH: loop header
LB: loop body
LE: loop exit
PB: predicated region body
PF: predicated region fallthrough
CT: control target
= control target key end

     0   :  { %12 = vsyncpa [#allocation3], 0  ;;  %s2015_s0 = inlined_call_operand.hbm [shape: f32[32,128], index: 0, kind: input, shape index: {}]   ;;  %s2016_s1 = inlined_call_operand.hbm [shape: bf16[128,128], index: 1, kind: input, shape index: {}]   ;;  %s2017_s2 = inlined_call_operand.vmem [shape: f32[1,128], index: 2, kind: input, shape index: {}]   ;;  %s2018_s3 = inlined_call_operand.hbm [shape: bf16[384,128], index: 3, kind: input, shape index: {}]   ;;  %s2019_s4 = inlined_call_operand.vmem [shape: f32[1,128], index: 4, kind: input, shape index: {}]   ;;  %s2020_s5 = inlined_call_operand.hbm [shape: bf16[128,128], index: 5, kind: input, shape index: {}]   ;;  %s2021_s6 = inlined_call_operand.vmem [shape: f32[1,128], index: 6, kind: input, shape index: {}]   ;;  %s2022_s7 = inlined_call_operand.hbm [shape: f32[32,128], index: 7, kind: output, shape index: {}]  }
   0x1   :  { %14 = vsyncpa [#allocation3 + $0x1], 0 }
   0x2   :  { %15 = vsyncpa [#allocation6], 0 }
   0x3   :  { %16 = vsyncpa [#allocation9], 0 }
   0x4   :  { %17 = vsyncpa [#allocation4], 0 }
   0x5   :  { %19 = vsyncpa [#allocation4 + $0x1], 0  ;;  %s1670_s24 = smov 0   ;;  %s1672_s25 = smov 0  }
   0x6   :  { %s1674_s26 = smov 0   ;;  %s1676_s27 = smov 0  }
   0x7 LB: > { %s1691_s28 = sadd.s32 4294967295, %s1614_s27   ;;  %s1080_s29 = sadd.s32 4294967294, %s1614_s27   ;;  %s1614_s27 = sphi %s1676_s27, %s2048_s27   ;;  %s1610_s26 = sphi %s1674_s26, %s2047_s26   ;;  %s1606_s25 = sphi %s1672_s25, %s2046_s25   ;;  %s1602_s24 = sphi %s1670_s24, %s2045_s24  }
   0x8   : > { %p45_p0 = scmp.ne.s32.totalorder %s1606_s25, %s1602_s24  ;;  %p2023_p1 = scmp.eq.s32.totalorder %s1691_s28, 0 }
   0x9   : > { %p201_p3 = scmp.eq.s32.totalorder %s1080_s29, 1  ;;  %p1081_p5 = scmp.ge.s32.totalorder %s1614_s27, 1 }
   0xa   : > { %p1700_p4 = por %p2023_p1, %p45_p0  ;;  %p208_p7 = scmp.lt.s32.totalorder %s1614_s27, 3 }
   0xb   : > { %p1705_p6 = por %p201_p3, %p45_p0  ;;  %s1616_s10 = smov [#allocation5]  }
   0xc   : > { %s2027_s30 = scalar_select %p1700_p4, 1, 0 }
   0xd   : > { %s2028_s8 = scalar_select %p1705_p6, 1, 0 }
   0xe   : > { %p1710_p8 = pnand %p1081_p5, %p208_p7  ;;  %s220_s11 = sshll.u32 %s1616_s10, 4  ;;  %s1714_s11 = int_to_ptr.vmem [resolvable:$true] %s220_s11 }
   0xf   : > { %2029 = sst [smem:[#allocation15_spill]] %s2028_s8  ;;  %s1617_s13 = smov [#allocation7]  }
  0x10   : > { %s2030_s9 = scalar_select %p1710_p8, 1, 0 }
  0x11   : > { %p1316_p9 = pneg %p1710_p8  ;;  %s236_s14 = sshll.u32 %s1617_s13, 4  ;;  %s1725_s14 = int_to_ptr.vmem [resolvable:$true] %s236_s14 }
  0x12   : > { %s1618_s15 = smov [#allocation8]   ;;  %s1426_s19 = scalar_lea.hbm %s2016_s1, 1024 }
  0x13   : > { %p1721_p11 = pnand %p1316_p9, %p2023_p1  ;;  %s1727_s16 = sshll.u32 %s1618_s15, 4  ;;  %s253_s16 = int_to_ptr.vmem [resolvable:$true] %s1727_s16 }
  0x14   : > { %p1427_p12 = scmp.ne.s32.totalorder %s2016_s1, %s1426_s19  ;;  %p1433_p5 = scmp.lt.u32.totalorder %s1426_s19, %s2016_s1 }
  0x15   : > { %p1737_p13 = pneg %p1721_p11 }
  0x17   : > { %p1429_p0 = pnand %p1737_p13, %p1427_p12 }
  0x19   : > { %p1430_p3 = pneg %p1429_p0 }
  0x1b   : > { %p1435_p7 = pnand %p1433_p5, %p1430_p3 }
  0x1d   : > { %1438 = shalt.err (!%p1435_p7)
}
  0x1e   : > { %s1439_s10 = scalar_lea.vmem %s1714_s11, 1024  ;;  %p1447_p2 = scmp.lt.s32.totalorder %s1714_s11, %s1714_s11 }
  0x1f   : > { %p1440_p9 = scmp.ne.s32.totalorder %s1714_s11, %s1439_s10  ;;  %p1448_p6 = scmp.lt.s32.totalorder %s1439_s10, %s1439_s10 }
  0x21   : > { %p1442_p10 = pnand %p1440_p9, %p1737_p13  ;;  %p1449_p12 = por %p1448_p6, %p1447_p2 }
  0x23   : > { %p1443_p1 = pneg %p1442_p10 }
  0x25   : > { %p1450_p0 = pnand %p1449_p12, %p1443_p1 }
  0x27   : > { %1453 = shalt.err (!%p1450_p0)
}
  0x28   : > { %s1619_s13 = smov 64   ;;  %s1620_s15 = smov 4  }
  0x29   : > { %1319 = dma.hbm_to_vmem [thread:$0]  (!%p1721_p11), %s2016_s1, 1024, %s1714_s11, [#allocation6], %s1619_s13, %s1619_s13, %s1620_s15  }
  0x2a   : > { %s1454_s21 = scalar_lea.hbm %s2018_s3, 3072 }
  0x2b   : > { %p1455_p1 = scmp.ne.s32.totalorder %s2018_s3, %s1454_s21  ;;  %p1461_p10 = scmp.lt.u32.totalorder %s1454_s21, %s2018_s3 }
  0x2d   : > { %p1457_p2 = pnand %p1455_p1, %p1737_p13 }
  0x2f   : > { %p1458_p6 = pneg %p1457_p2 }
  0x31   : > { %p1463_p3 = pnand %p1461_p10, %p1458_p6 }
  0x33   : > { %1466 = shalt.err (!%p1463_p3)
}
  0x34   : > { %s1467_s11 = scalar_lea.vmem %s1725_s14, 3072  ;;  %p1475_p12 = scmp.lt.s32.totalorder %s1725_s14, %s1725_s14 }
  0x35   : > { %p1468_p5 = scmp.ne.s32.totalorder %s1725_s14, %s1467_s11  ;;  %p1476_p0 = scmp.lt.s32.totalorder %s1467_s11, %s1467_s11 }
  0x37   : > { %p1470_p7 = pnand %p1468_p5, %p1737_p13  ;;  %p1477_p1 = por %p1476_p0, %p1475_p12 }
  0x39   : > { %p1471_p9 = pneg %p1470_p7 }
  0x3b   : > { %p1478_p2 = pnand %p1477_p1, %p1471_p9 }
  0x3d   : > { %1481 = shalt.err (!%p1478_p2)
}
  0x3e   : > { %1322 = dma.hbm_to_vmem [thread:$0]  (!%p1721_p11), %s2018_s3, 3072, %s1725_s14, [#allocation6], %s1619_s13, %s1619_s13, %s1620_s15  }
  0x3f   : > { %s1482_s20 = scalar_lea.hbm %s2020_s5, 1024 }
  0x40   : > { %p1483_p6 = scmp.ne.s32.totalorder %s2020_s5, %s1482_s20  ;;  %p1489_p5 = scmp.lt.u32.totalorder %s1482_s20, %s2020_s5 }
  0x42   : > { %p1485_p10 = pnand %p1483_p6, %p1737_p13 }
  0x44   : > { %p1486_p3 = pneg %p1485_p10 }
  0x46   : > { %p1491_p7 = pnand %p1489_p5, %p1486_p3 }
  0x48   : > { %1494 = shalt.err (!%p1491_p7)
}
  0x49   : > { %s1495_s11 = scalar_lea.vmem %s253_s16, 1024  ;;  %p1503_p1 = scmp.lt.s32.totalorder %s253_s16, %s253_s16 }
  0x4a   : > { %p1496_p9 = scmp.ne.s32.totalorder %s253_s16, %s1495_s11  ;;  %p1504_p2 = scmp.lt.s32.totalorder %s1495_s11, %s1495_s11 }
  0x4c   : > { %p1498_p12 = pnand %p1496_p9, %p1737_p13  ;;  %p1505_p4 = por %p1504_p2, %p1503_p1 }
  0x4e   : > { %p1499_p0 = pneg %p1498_p12 }
  0x50   : > { %p1506_p8 = pnand %p1505_p4, %p1499_p0 }
  0x52   : > { %1509 = shalt.err (!%p1506_p8)
}
  0x53   : > { %1325 = dma.hbm_to_vmem [thread:$0]  (!%p1721_p11), %s2020_s5, 1024, %s253_s16, [#allocation9], %s1619_s13, %s1619_s13, %s1620_s15  }
  0x54   : > { %s1810_s22 = sadd.s32 1, %s1614_s27   ;;  %s32_s17 = sadd.s32 1, %s1610_s26 }
  0x55   : > { %s29_s12 = ssub.s32 %s1614_s27, %s1810_s22  ;;  %p39_p8 = scmp.ne.s32.totalorder %s1610_s26, %s1606_s25 }
  0x56   : > { %p30_p4 = scmp.eq.s32.totalorder %s29_s12, 0  ;;  %p40_p13 = scmp.eq.s32.totalorder %s1614_s27, 0 }
  0x57   : > { %p1337_p6 = scmp.lt.s32.totalorder %s1614_s27, 2  ;;  %p2033_p3 = scmp.eq.s32.totalorder %s1691_s28, 1 }
  0x58   : > { %s1820_s18 = scalar_select %p30_p4, %s1610_s26, %s32_s17  }
  0x59   : > { %p41_p10 = por %p40_p13, %p39_p8  ;;  %p1824_p5 = por %p2033_p3, %p39_p8 }
  0x5a   : > { %s269_s20 = sand.u32 1, %s1610_s26   ;;  %s1151_s21 = sshll.u32 %s1614_s27, 8 }
  0x5b   : > { %s1086_s16 = sshll.u32 %s269_s20, 4  ;;  %s1833_s23 = scalar_lea.hbm %s2015_s0, %s1151_s21 }
  0x5c   : > { %s273_s29 = scalar_lea.vmem [#allocation2], %s1086_s16  ;;  %p1835_p11 = pnand %p1337_p6, %p41_p10 }
  0x5d   : > { %s280_s10 = sshll.u32 %s273_s29, 4  ;;  %s1841_s14 = scalar_lea.sflag [#allocation3], %s269_s20  ;;  %s1839_s10 = int_to_ptr.vmem [resolvable:$true] %s280_s10 }
  0x5e   : > { %s1510_s8 = scalar_lea.hbm %s1833_s23, 256  ;;  %p1512_p9 = pneg %p1835_p11 }
  0x5f   : > { %p1511_p7 = scmp.ne.s32.totalorder %s1833_s23, %s1510_s8  ;;  %s1515_s21 = scalar_lea.hbm %s2015_s0, 512 }
  0x60   : > { %p1516_p1 = scmp.lt.u32.totalorder %s1833_s23, %s2015_s0  ;;  %p1517_p2 = scmp.lt.u32.totalorder %s1515_s21, %s1510_s8 }
  0x61   : > { %p1513_p12 = pnand %p1512_p9, %p1511_p7  ;;  %p1519_p8 = scmp.lt.u32.totalorder %s1510_s8, %s1833_s23 }
  0x62   : > { %p1518_p4 = por %p1517_p2, %p1516_p1 }
  0x63   : > { %p1514_p0 = pneg %p1513_p12 }
  0x64   : > { %p1520_p13 = por %p1519_p8, %p1518_p4 }
  0x66   : > { %p1521_p6 = pnand %p1520_p13, %p1514_p0 }
  0x68   : > { %1524 = shalt.err (!%p1521_p6)
}
  0x69   : > { %s1525_s20 = scalar_lea.vmem %s1839_s10, 256  ;;  %s1621_s15 = smov [#allocation2]  }
  0x6a   : > { %p1526_p10 = scmp.ne.s32.totalorder %s1839_s10, %s1525_s20  ;;  %s1530_s29 = sshll.u32 %s1621_s15, 4  ;;  %s1531_s29 = int_to_ptr.vmem [resolvable:$false] %s1530_s29 }
  0x6b   : > { %s1532_s12 = scalar_lea.vmem %s1531_s29, 512  ;;  %p1533_p12 = scmp.lt.s32.totalorder %s1839_s10, %s1531_s29 }
  0x6c   : > { %p1528_p3 = pnand %p1526_p10, %p1512_p9  ;;  %p1534_p1 = scmp.lt.s32.totalorder %s1532_s12, %s1525_s20 }
  0x6e   : > { %p1529_p7 = pneg %p1528_p3  ;;  %p1535_p2 = por %p1534_p1, %p1533_p12 }
  0x70   : > { %p1536_p4 = pnand %p1535_p2, %p1529_p7 }
  0x72   : > { %1539 = shalt.err (!%p1536_p4)
}
  0x73   : > { %s1622_s8 = smov 128   ;;  %s1623_s17 = smov 8  }
  0x74   : > { %1329 = dma.hbm_to_vmem [thread:$0]  (!%p1835_p11), %s1833_s23, 256, %s1839_s10, %s1841_s14, %s1622_s8, %s1622_s8, %s1623_s17  }
  0x75   : > { %p2036_p9 = scmp.ne.s32.totalorder %s2030_s9, 0 }
  0x76   : > { %s1872_s21 = sand.u32 (!%p2036_p9), 1, %s1606_s25   ;;  %p2037_p0 = scmp.ne.s32.totalorder (!%p2036_p9), %s2027_s30, 0 }
  0x77   : > { %292 = sbr.rel (%p2036_p9) target bundleno = 877 (0x36d), region = 48  ;;  %s1090_s16 = sshll.u32 (!%p2036_p9), %s1872_s21, 4 }
  0x78   : > { %s295_s13 = scalar_lea.sflag (!%p2036_p9), [#allocation3], %s1872_s21  ;;  %s1878_s20 = scalar_lea.vmem (!%p2036_p9), [#allocation2], %s1090_s16 }
  0x7e   : > { %1585 = dma.done.wait (%p2037_p0), %s295_s13, 256  }
  0x7f   : > { %1587 = vsyncadd (%p2037_p0), %s295_s13, 4294967040  ;;  %p2038_p11 = scmp.eq.s32.totalorder %s1691_s28, 0 }
  0x81   : > { %1589 = dma.done.wait (%p2038_p11), [#allocation6], 4096   ;;  %p2039_p8 = pmov %p2038_p11 }
  0x83   : > { %1591 = vsyncadd (%p2039_p8), [#allocation6], 4294963200  ;;  %p2040_p13 = pmov %p2039_p8 }
  0x84   : > { %p2041_p6 = pmov %p2039_p8 }
  0x85   : > { %1593 = dma.done.wait (%p2040_p13), [#allocation9], 1024  }
  0x86   : > { %1595 = vsyncadd (%p2041_p6), [#allocation9], 4294966272  ;;  %v1624_v0 = vmov 0.0   ;;  %vm1625_vm0 = vmmov 0   ;;  %v1386_v1 = vld [vmem:[#allocation5] sm:$0xff]   ;;  %v1387_v2 = vld [vmem:[#allocation5 + $0x8] sm:$0xff]   ;;  %v461_v28 = vlaneseq }
  0x87   : > { %1200 = vmatprep.subr.bf16.mxu0 %v1624_v0  ;;  %1216 = vmatprep.mubr.msk.bf16.mxu0 %vm1625_vm0, %v1624_v0  ;;  %v1388_v3 = vld [vmem:[#allocation5 + $0x10] sm:$0xff]   ;;  %v1394_v4 = vld [vmem:[#allocation7 + $0x40] sm:$0xff]   ;;  %v1389_v5 = vld [vmem:[#allocation5 + $0x18] sm:$0xff]   ;;  %vm1626_vm4 = vmmov 1   ;;  %s340_s15 = scalar_lea.vmem [#allocation10], %s1090_s16  ;;  %s1152_s12 = sshll.u32 %s1691_s28, 8 }
  0x88   : > { %1220 = vmatprep.subr.bf16.mxu1 %v1624_v0  ;;  %1236 = vmatprep.mubr.msk.bf16.mxu1 %vm1625_vm0, %v1624_v0  ;;  %v1395_v6 = vld [vmem:[#allocation7 + $0x48] sm:$0xff]   ;;  %v1390_v7 = vld [vmem:[#allocation5 + $0x20] sm:$0xff]   ;;  %v1397_v8 = vld [vmem:[#allocation7 + $0x50] sm:$0xff]   ;;  %v462_v30 = vshrl.u32 %v461_v28, 7  ;;  %s978_s29 = sshll.u32 %s340_s15, 4  ;;  %s1971_s16 = scalar_lea.hbm %s2022_s7, %s1152_s12  ;;  %s1965_s29 = int_to_ptr.vmem [resolvable:$true] %s978_s29 }
  0x89   : > { %1201 = vmatpush3.bf16.msra.mxu0 %v1386_v1  ;;  %1221 = vmatpush3.bf16.msra.mxu1 %v1394_v4  ;;  %v1391_v9 = vld [vmem:[#allocation5 + $0x28] sm:$0xff]   ;;  %v1399_v10 = vld [vmem:[#allocation7 + $0x58] sm:$0xff]   ;;  %v1392_v11 = vld [vmem:[#allocation5 + $0x30] sm:$0xff]   ;;  %s965_s13 = scalar_lea.sflag [#allocation4], %s1872_s21  ;;  %s1627_s28 = smov [#allocation10]  }
  0x8a   : > { %1202 = vmatprep.subr.bf16.mxu0 %v1624_v0  ;;  %1222 = vmatprep.subr.bf16.mxu1 %v1624_v0  ;;  %v1401_v12 = vld [vmem:[#allocation7 + $0x60] sm:$0xff]   ;;  %v1393_v13 = vld [vmem:[#allocation5 + $0x38] sm:$0xff]   ;;  %v1403_v16 = vld [vmem:[#allocation7 + $0x68] sm:$0xff]   ;;  %v468_v35 = vand.u32 15, %v462_v30  ;;  %vm492_vm1 = vcmp.lt.s32.totalorder %v462_v30, 1  ;;  %vm505_vm2 = vcmp.lt.s32.totalorder %v462_v30, 7 }
  0x8b   : > { %v1908_v14 = vld [vmem:[%s1878_s20] sm:$0xff]  ;;  %v1911_v15 = vld [vmem:[%s1878_s20 + $0x8] sm:$0xff]  ;;  %v463_v57 = vadd.s32 8, %v462_v30  ;;  %s1540_s20 = scalar_lea.vmem %s1965_s29, 256  ;;  %s1544_s30 = sshll.u32 %s1627_s28, 4  ;;  %s1545_s30 = int_to_ptr.vmem [resolvable:$false] %s1544_s30 }
  0x8c   : > { %v1396_v17 = vld [vmem:[#allocation7] sm:$0xff]   ;;  %v346_v18 = vpack.c.bf16 %v1911_v15, %v1908_v14  ;;  %v1398_v19 = vld [vmem:[#allocation7 + $0x8] sm:$0xff]   ;;  %v1400_v20 = vld [vmem:[#allocation7 + $0x10] sm:$0xff]   ;;  %vm1153_vm3 = vcmp.ne.s32.totalorder %v468_v35, 0  ;;  %p1541_p10 = scmp.ne.s32.totalorder %s1965_s29, %s1540_s20  ;;  %s1546_s9 = scalar_lea.vmem %s1545_s30, 512 }
  0x8d   : > { %1203 = vmatpush3.bf16.msra.mxu0 %v1387_v2  ;;  %1223 = vmatpush3.bf16.msra.mxu1 %v1395_v6  ;;  %v1402_v21 = vld [vmem:[#allocation7 + $0x18] sm:$0xff]   ;;  %v1404_v22 = vld [vmem:[#allocation7 + $0x20] sm:$0xff]   ;;  %v1405_v23 = vld [vmem:[#allocation7 + $0x70] sm:$0xff]   ;;  %v475_v59 = vand.u32 15, %v463_v57  ;;  %p1547_p12 = scmp.lt.s32.totalorder %s1965_s29, %s1545_s30  ;;  %p1548_p1 = scmp.lt.s32.totalorder %s1546_s9, %s1540_s20 }
  0x8e   : > { %1204 = vmatprep.subr.bf16.mxu0 %v1624_v0  ;;  %1224 = vmatprep.subr.bf16.mxu1 %v1624_v0  ;;  %v1406_v24 = vld [vmem:[#allocation7 + $0x28] sm:$0xff]   ;;  %v1407_v25 = vld [vmem:[#allocation7 + $0x78] sm:$0xff]   ;;  %v1408_v26 = vld [vmem:[#allocation7 + $0x30] sm:$0xff]   ;;  %p1542_p3 = pnand %p1541_p10, %p1824_p5 }
  0x8f   : > { %v1409_v27 = vld [vmem:[#allocation7 + $0x38] sm:$0xff]   ;;  %v1095_v29 = vld [vmem:[%s2017_s2] ss:$0 sm:$0xff]  ;;  %vm1121_vm5 = vmpackc.low %vm1626_vm4, %vm1153_vm3  ;;  %vm1154_vm6 = vcmp.ne.s32.totalorder %v475_v59, 15  ;;  %p1549_p2 = por %p1548_p1, %p1547_p12 }
  0x90   : > { %v1410_v41 = vld [vmem:[#allocation7 + $0x80] sm:$0xff]   ;;  %v1411_v52 = vld [vmem:[#allocation7 + $0x88] sm:$0xff]   ;;  %v1412_v53 = vld [vmem:[#allocation7 + $0x90] sm:$0xff]   ;;  %p1543_p7 = pneg %p1542_p3 }
  0x91   : > { %1205 = vmatpush3.bf16.msra.mxu0 %v1388_v3  ;;  %1225 = vmatpush3.bf16.msra.mxu1 %v1397_v8  ;;  %v1413_v54 = vld [vmem:[#allocation7 + $0x98] sm:$0xff]   ;;  %v1414_v55 = vld [vmem:[#allocation7 + $0xa0] sm:$0xff]   ;;  %v1415_v56 = vld [vmem:[#allocation7 + $0xa8] sm:$0xff]  }
  0x92   : > { %1206 = vmatprep.subr.bf16.mxu0 %v1624_v0  ;;  %1226 = vmatprep.subr.bf16.mxu1 %v1624_v0  ;;  %v1416_v58 = vld [vmem:[#allocation7 + $0xb0] sm:$0xff]   ;;  %v1417_v60 = vld [vmem:[#allocation7 + $0xb8] sm:$0xff]   ;;  %vm1133_vm7 = vmpackc.low %vm1154_vm6, %vm1626_vm4  ;;  %p1550_p4 = pnand %p1549_p2, %p1543_p7 }
  0x93   : > { %v1418_v61 = vld [vmem:[#allocation8] sm:$0xff]   ;;  %v1419_v62 = vld [vmem:[#allocation8 + $0x8] sm:$0xff]   ;;  %v1420_v63 = vld [vmem:[#allocation8 + $0x10] sm:$0xff]  }
  0x94   : > { %v1421_v1 = vld [vmem:[#allocation8 + $0x18] sm:$0xff]   ;;  %v1422_v2 = vld [vmem:[#allocation8 + $0x20] sm:$0xff]   ;;  %v1423_v3 = vld [vmem:[#allocation8 + $0x28] sm:$0xff]  }
  0x95   : > { %1207 = vmatpush3.bf16.msra.mxu0 %v1389_v5  ;;  %1227 = vmatpush3.bf16.msra.mxu1 %v1399_v10  ;;  %v1424_v4 = vld [vmem:[#allocation8 + $0x30] sm:$0xff]   ;;  %v1425_v5 = vld [vmem:[#allocation8 + $0x38] sm:$0xff]  }
  0x96   : > { %1208 = vmatprep.subr.bf16.mxu0 %v1624_v0  ;;  %1228 = vmatprep.subr.bf16.mxu1 %v1624_v0 }
  0x99   : > { %1209 = vmatpush3.bf16.msra.mxu0 %v1390_v7  ;;  %1229 = vmatpush3.bf16.msra.mxu1 %v1401_v12 }
  0x9a   : > { %1210 = vmatprep.subr.bf16.mxu0 %v1624_v0  ;;  %1230 = vmatprep.subr.bf16.mxu1 %v1624_v0 }
  0x9d   : > { %1211 = vmatpush3.bf16.msra.mxu0 %v1391_v9  ;;  %1231 = vmatpush3.bf16.msra.mxu1 %v1403_v16 }
  0x9e   : > { %1212 = vmatprep.subr.bf16.mxu0 %v1624_v0  ;;  %1232 = vmatprep.subr.bf16.mxu1 %v1624_v0 }
  0xa1   : > { %1213 = vmatpush3.bf16.msra.mxu0 %v1392_v11  ;;  %1233 = vmatpush3.bf16.msra.mxu1 %v1405_v23 }
  0xa2   : > { %1214 = vmatprep.subr.bf16.mxu0 %v1624_v0  ;;  %1234 = vmatprep.subr.bf16.mxu1 %v1624_v0 }
  0xa5   : > { %1215 = vmatpush3.bf16.msra.mxu0 %v1393_v13  ;;  %1235 = vmatpush3.bf16.msra.mxu1 %v1407_v25 }
  0xa6   : > { %1240 = vmatprep.subr.bf16.mxu0 %v1624_v0  ;;  %1260 = vmatprep.subr.bf16.mxu1 %v1624_v0 }
  0xa8   : > { %1217 = vmatmul.mubr.bf16.vlgmr.msra.gmra.mrb[0].mxu0 %v346_v18 }
  0xa9   : > { %1241 = vmatpush3.bf16.msra.mxu0 %v1396_v17  ;;  %1256 = vmatprep.mubr.msk.bf16.mxu0 %vm1625_vm0, %v1624_v0 }
  0xaa   : > { %1242 = vmatprep.subr.bf16.mxu0 %v1624_v0 }
  0xad   : > { %1243 = vmatpush3.bf16.msra.mxu0 %v1398_v19  ;;  %v1136_v19 = vld [vmem:[%s2019_s4] ss:$0 sm:$0xff] }
  0xae   : > { %1244 = vmatprep.subr.bf16.mxu0 %v1624_v0 }
  0xb1   : > { %1245 = vmatpush3.bf16.msra.mxu0 %v1400_v20 }
  0xb2   : > { %1246 = vmatprep.subr.bf16.mxu0 %v1624_v0 }
  0xb5   : > { %1247 = vmatpush3.bf16.msra.mxu0 %v1402_v21 }
  0xb6   : > { %1248 = vmatprep.subr.bf16.mxu0 %v1624_v0 }
  0xb9   : > { %1249 = vmatpush3.bf16.msra.mxu0 %v1404_v22 }
  0xba   : > { %1250 = vmatprep.subr.bf16.mxu0 %v1624_v0 }
  0xbd   : > { %1251 = vmatpush3.bf16.msra.mxu0 %v1406_v24 }
  0xbe   : > { %1252 = vmatprep.subr.bf16.mxu0 %v1624_v0 }
  0xc1   : > { %1253 = vmatpush3.bf16.msra.mxu0 %v1408_v26 }
  0xc2   : > { %1254 = vmatprep.subr.bf16.mxu0 %v1624_v0 }
  0xc5   : > { %1255 = vmatpush3.bf16.msra.mxu0 %v1409_v27 }
  0xc6   : > { %1280 = vmatprep.subr.bf16.mxu0 %v1624_v0 }
 0x17b   : > { %v452_v31 = vpop.f32.mrb[0].mxu0 }
 0x17c   : > { %v453_v32 = vadd.f32 %v1095_v29, %v452_v31  ;;  %v1218_v33 = vpop.f32.mrb[1].mxu0 }
 0x17d   : > { %v455_v34 = vpop.f32.mrb[2].mxu0 }
 0x17e   : > { %v459_v36 = vmax.f32 %v453_v32, 0.0  ;;  %v456_v37 = vadd.f32 %v1095_v29, %v455_v34  ;;  %v1219_v38 = vpop.f32.mrb[3].mxu0  ;;  %v1137_v29 = vld [vmem:[%s2021_s6] ss:$0 sm:$0xff] }
 0x180   : > { %v460_v39 = vmax.f32 %v456_v37, 0.0  ;;  %v490_v40 = vrot.slane %v459_v36, 7  ;;  %v503_v42 = vrot.slane %v459_v36, 1 }
 0x182   : > { %v491_v43 = vrot.slane %v460_v39, 7  ;;  %v504_v44 = vrot.slane %v460_v39, 1  ;;  %v531_v45 = vpack.c.bf16 %v460_v39, %v459_v36 }
 0x184   : > { %v493_v46 = vsel %vm492_vm1, %v490_v40, %v491_v43  ;;  %v494_v47 = vsel %vm492_vm1, %v491_v43, %v490_v40  ;;  %v506_v48 = vsel %vm505_vm2, %v503_v42, %v504_v44  ;;  %v507_v49 = vsel %vm505_vm2, %v504_v44, %v503_v42  ;;  %1237 = vmatmul.mubr.bf16.vlgmr.msra.gmra.mrb[0].mxu1 %v531_v45 }
 0x185   : > { %v1122_v50 = vpack.c.bf16 %v493_v46, %v494_v47  ;;  %v1134_v51 = vpack.c.bf16 %v507_v49, %v506_v48  ;;  %1261 = vmatpush3.bf16.msra.mxu1 %v1410_v41  ;;  %1276 = vmatprep.mubr.msk.bf16.mxu1 %vm1625_vm0, %v1624_v0 }
 0x186   : > { %1262 = vmatprep.subr.bf16.mxu1 %v1624_v0 }
 0x187   : > { %1257 = vmatmul.mubr.msk.bf16.vlgmr.msra.gmra.mrb[4].mxu0 %vm1121_vm5, %v1122_v50 }
 0x188   : > { %1296 = vmatprep.mubr.msk.bf16.mxu0 %vm1625_vm0, %v1624_v0  ;;  %1281 = vmatpush3.bf16.msra.mxu0 %v1418_v61 }
 0x189   : > { %1263 = vmatpush3.bf16.msra.mxu1 %v1411_v52  ;;  %1282 = vmatprep.subr.bf16.mxu0 %v1624_v0 }
 0x18a   : > { %1264 = vmatprep.subr.bf16.mxu1 %v1624_v0 }
 0x18c   : > { %1283 = vmatpush3.bf16.msra.mxu0 %v1419_v62 }
 0x18d   : > { %1265 = vmatpush3.bf16.msra.mxu1 %v1412_v53  ;;  %1284 = vmatprep.subr.bf16.mxu0 %v1624_v0 }
 0x18e   : > { %1266 = vmatprep.subr.bf16.mxu1 %v1624_v0 }
 0x190   : > { %1285 = vmatpush3.bf16.msra.mxu0 %v1420_v63 }
 0x191   : > { %1267 = vmatpush3.bf16.msra.mxu1 %v1413_v54  ;;  %1286 = vmatprep.subr.bf16.mxu0 %v1624_v0 }
 0x192   : > { %1268 = vmatprep.subr.bf16.mxu1 %v1624_v0 }
 0x194   : > { %1287 = vmatpush3.bf16.msra.mxu0 %v1421_v1 }
 0x195   : > { %1269 = vmatpush3.bf16.msra.mxu1 %v1414_v55  ;;  %1288 = vmatprep.subr.bf16.mxu0 %v1624_v0 }
 0x196   : > { %1270 = vmatprep.subr.bf16.mxu1 %v1624_v0 }
 0x198   : > { %1289 = vmatpush3.bf16.msra.mxu0 %v1422_v2 }
 0x199   : > { %1271 = vmatpush3.bf16.msra.mxu1 %v1415_v56  ;;  %1290 = vmatprep.subr.bf16.mxu0 %v1624_v0 }
 0x19a   : > { %1272 = vmatprep.subr.bf16.mxu1 %v1624_v0 }
 0x19c   : > { %1291 = vmatpush3.bf16.msra.mxu0 %v1423_v3 }
 0x19d   : > { %1273 = vmatpush3.bf16.msra.mxu1 %v1416_v58  ;;  %1292 = vmatprep.subr.bf16.mxu0 %v1624_v0 }
 0x19e   : > { %1274 = vmatprep.subr.bf16.mxu1 %v1624_v0 }
 0x1a0   : > { %1293 = vmatpush3.bf16.msra.mxu0 %v1424_v4 }
 0x1a1   : > { %1275 = vmatpush3.bf16.msra.mxu1 %v1417_v60  ;;  %1294 = vmatprep.subr.bf16.mxu0 %v1624_v0 }
 0x1a4   : > { %1277 = vmatmul.mubr.msk.bf16.vlgmr.msra.gmra.mrb[4].mxu1 %vm1133_vm7, %v1134_v51  ;;  %1295 = vmatpush3.bf16.msra.mxu0 %v1425_v5 }
 0x257   : > { %v630_v6 = vpop.f32.mrb[0].mxu1 }
 0x258   : > { %v1238_v7 = vpop.f32.mrb[1].mxu1 }
 0x259   : > { %v633_v8 = vpop.f32.mrb[2].mxu1 }
 0x25a   : > { %v1239_v9 = vpop.f32.mrb[3].mxu1  ;;  %v719_v10 = vpop.f32.mrb[4].mxu0 }
 0x25b   : > { %v720_v11 = vadd.f32 %v719_v10, %v630_v6  ;;  %v1258_v12 = vpop.f32.mrb[5].mxu0 }
 0x25c   : > { %v722_v13 = vpop.f32.mrb[6].mxu0 }
 0x25d   : > { %v723_v16 = vadd.f32 %v722_v13, %v633_v8  ;;  %v1259_v17 = vpop.f32.mrb[7].mxu0 }
 0x277   : > { %v825_v18 = vpop.f32.mrb[4].mxu1 }
 0x278   : > { %v832_v20 = vadd.f32 %v825_v18, %v720_v11  ;;  %v1278_v0 = vpop.f32.mrb[5].mxu1 }
 0x279   : > { %v828_v21 = vpop.f32.mrb[6].mxu1 }
 0x27a   : > { %v841_v22 = vadd.f32 %v1136_v19, %v832_v20  ;;  %v833_v23 = vadd.f32 %v828_v21, %v723_v16  ;;  %v1279_v24 = vpop.f32.mrb[7].mxu1 }
 0x27c   : > { %v842_v25 = vadd.f32 %v1136_v19, %v833_v23  ;;  %v843_v26 = vmax.f32 %v841_v22, 0.0 }
 0x27e   : > { %v844_v27 = vmax.f32 %v842_v25, 0.0 }
 0x280   : > { %v845_v28 = vpack.c.bf16 %v844_v27, %v843_v26 }
 0x282   : > { %1297 = vmatmul.mubr.bf16.vlgmr.msra.gmra.mrb[8].mxu0 %v845_v28 }
 0x355   : > { %v951_v30 = vpop.f32.mrb[8].mxu0 }
 0x356   : > { %v952_v31 = vadd.f32 %v1137_v29, %v951_v30  ;;  %v1298_v32 = vpop.f32.mrb[9].mxu0 }
 0x357   : > { %v954_v33 = vpop.f32.mrb[10].mxu0 }
 0x358   : > { %v958_v34 = vadd.f32 %v952_v31, %v1908_v14  ;;  %v955_v35 = vadd.f32 %v1137_v29, %v954_v33  ;;  %v1299_v36 = vpop.f32.mrb[11].mxu0 }
 0x35a   : > { %v960_v37 = vmax.f32 %v958_v34, 0.0  ;;  %v959_v38 = vadd.f32 %v955_v35, %v1911_v15 }
 0x35c   : > { %962 = vst [vmem:[%s340_s15] sm:$0xff] %v960_v37  ;;  %v961_v39 = vmax.f32 %v959_v38, 0.0 }
 0x35e   : > { %963 = vst [vmem:[%s340_s15 + $0x8] sm:$0xff] %v961_v39 }
 0x35f   : > { %1553 = shalt.err (!%p1550_p4)
}
 0x360   : > { %s1554_s23 = scalar_lea.hbm %s1971_s16, 256  ;;  %s1558_s14 = scalar_lea.hbm %s2022_s7, 512 }
 0x361   : > { %p1555_p9 = scmp.ne.s32.totalorder %s1971_s16, %s1554_s23  ;;  %p1559_p8 = scmp.lt.u32.totalorder %s1971_s16, %s2022_s7 }
 0x362   : > { %p1560_p13 = scmp.lt.u32.totalorder %s1558_s14, %s1554_s23  ;;  %p1562_p10 = scmp.lt.u32.totalorder %s1554_s23, %s1971_s16 }
 0x363   : > { %p1556_p0 = pnand %p1555_p9, %p1824_p5 }
 0x364   : > { %p1561_p6 = por %p1560_p13, %p1559_p8 }
 0x365   : > { %p1557_p11 = pneg %p1556_p0 }
 0x366   : > { %p1563_p3 = por %p1562_p10, %p1561_p6 }
 0x368   : > { %p1564_p7 = pnand %p1563_p3, %p1557_p11 }
 0x36a   : > { %1567 = shalt.err (!%p1564_p7)
}
 0x36b   : > { %s1628_s8 = smov 128   ;;  %s1629_s17 = smov 8  }
 0x36c   : > { %1314 = dma.vmem_to_hbm [thread:$0]  (%p1824_p5), %s1965_s29, 256, %s1971_s16, %s965_s13, %s1628_s8, %s1628_s8, %s1629_s17  }
 0x36d PF: > { %s2042_s20 = sld [smem:[#allocation15_spill]]  ;;  %s993_s28 = sand.u32 1, %s1602_s24  }
 0x36e   : > { %p2044_p1 = scmp.ge.s32.totalorder %s1614_s27, 2  ;;  %s994_s30 = scalar_lea.sflag [#allocation4], %s993_s28 }
 0x373   : > { %p2043_p12 = scmp.ne.s32.totalorder %s2042_s20, 0 }
 0x375   : > { %p1331_p2 = pnand %p2044_p1, %p2043_p12 }
 0x377   : > { %1597 = dma.done.wait (!%p1331_p2), %s994_s30, 256  }
 0x378   : > { %1599 = vsyncadd (!%p1331_p2), %s994_s30, 4294967040  ;;  %p22_p4 = scmp.ge.s32.totalorder %s1810_s22, 4   ;;  %s2045_s24 = smov %s1606_s25 }
 0x379   : > { %s2046_s25 = smov %s1610_s26  ;;  %s2047_s26 = smov %s1820_s18 }
 0x37a   : > { %s2048_s27 = smov %s1810_s22  ;;  %24 = sbr.rel (!%p22_p4) target bundleno = 7 (0x7), region = 105 }
 0x381   :  { %999 = vsyncpa [#allocation3], 1 }
 0x382   :  { %1001 = vsyncpa [#allocation3 + $0x1], 1 }
 0x383   :  { %1002 = vsyncpa [#allocation6], 1 }
 0x384   :  { %1003 = vsyncpa [#allocation9], 1 }
 0x385   :  { %1004 = vsyncpa [#allocation4], 1 }
 0x386   :  { %1006 = vsyncpa [#allocation4 + $0x1], 1 }

</bundles_post_ra>
